<compile_context>
chip_gen: v6e
topology: v6e:2x2x1
jax: 0.10.0
libtpu: 0.0.40
codegen_flags: <defaults>
</compile_context>

<pallas_src>
import jax
import jax.numpy as jnp
from jax.experimental import pallas as pl
from jax.experimental.pallas import tpu as pltpu

# ----------------------------- configuration -----------------------------
BATCH = 2
SEQ = 16            # max_length (small, hardware-friendly)
HIDDEN = 128
NUM_HEADS = 4
HEAD_DIM = HIDDEN // NUM_HEADS
FFN = 256
NUM_LAYERS = 2
VOCAB = 64
MAX_POS = 64
PAD_ID = 1          # roberta padding_idx
NUM_LABELS = 2
LOGIT_PAD = 128     # pad logits to a full lane width for a dense store
LN_EPS = 1e-5

BS_TOK = BATCH * SEQ            # 32: batch folded into the matmul M dimension
NHBS = NUM_HEADS * BS_TOK       # 128: packed score width (head blocks along lanes)


# ----------------------------- fused model kernel -----------------------------
def _model_kernel(
    emb_ref, bias_ref, ones_ref, eg_ref, eb_ref,
    wqkv_ref, bqkv_ref, wo_ref, bo_ref, ln1g_ref, ln1b_ref,
    wi_ref, bi_ref, wo2_ref, bo2_ref, ln2g_ref, ln2b_ref,
    clsw_ref, clsb_ref, outw_ref, outb_ref,
    o_ref,
    x_ref, kblk_ref, vblk_ref,
):
    """Grid = (layer,).  x_ref: (B*S, H) VMEM-resident activations.

    kblk_ref / vblk_ref: (NUM_HEADS*B*S, H) bf16 block-diagonal head-packing
    scratch (zeroed once; diagonal 32x32 blocks overwritten every layer).
    """
    l = pl.program_id(0)

    def mm(a, w):
        # activations cast to bf16; weights are already bf16 in HBM/VMEM.
        return jnp.dot(a.astype(jnp.bfloat16), w,
                       preferred_element_type=jnp.float32)

    def layer_norm(h, g, b):
        # one-pass statistics: var = E[x^2] - E[x]^2
        m1 = jnp.mean(h, axis=-1, keepdims=True)
        m2 = jnp.mean(h * h, axis=-1, keepdims=True)
        var = m2 - m1 * m1
        return (h - m1) * jax.lax.rsqrt(var + LN_EPS) * g + b

    # ---- embeddings LayerNorm + scratch init (first grid step only) ----
    @pl.when(l == 0)
    def _():
        x_ref[...] = layer_norm(emb_ref[...], eg_ref[...], eb_ref[...])
        kblk_ref[...] = jnp.zeros_like(kblk_ref)
        vblk_ref[...] = jnp.zeros_like(vblk_ref)

    x = x_ref[...]                       # (B*S, H) f32
    bias = bias_ref[...]                 # (B*S, NHBS) additive mask (per head block)

    # ---- multi-head self-attention (fused QKV, block-diagonal head packing) ----
    # 1/sqrt(head_dim) is already folded into the Q columns of wqkv/bqkv.
    qkv = mm(x, wqkv_ref[l]) + bqkv_ref[l]            # (B*S, 3H) f32

    # scatter K/V head slices onto the block diagonal (lane offsets align with
    # the source vreg lane positions -> masked stores, no lane rotation).
    for h in range(NUM_HEADS):
        rs = h * BS_TOK
        cs = h * HEAD_DIM
        kblk_ref[rs:rs + BS_TOK, cs:cs + HEAD_DIM] = (
            qkv[:, HIDDEN + cs:HIDDEN + cs + HEAD_DIM].astype(jnp.bfloat16))
        vblk_ref[rs:rs + BS_TOK, cs:cs + HEAD_DIM] = (
            qkv[:, 2 * HIDDEN + cs:2 * HIDDEN + cs + HEAD_DIM].astype(jnp.bfloat16))

    q = qkv[:, :HIDDEN].astype(jnp.bfloat16)           # (B*S, H)
    # scores[:, h*BS:(h+1)*BS] = Q_h @ K_h^T   (one lane-dense MXU op)
    s = jax.lax.dot_general(q, kblk_ref[...], (((1,), (1,)), ((), ())),
                            preferred_element_type=jnp.float32)   # (B*S, NHBS)
    s = s + bias
    # row-wide shift is softmax-invariant even though heads share the row
    s = s - jnp.max(s, axis=-1, keepdims=True)
    p = jnp.exp(s)
    # per-head denominators broadcast back to the packed layout via a
    # block-diagonal ones matmul (no cross-lane reduction / reshape needed)
    denom = jnp.dot(p, ones_ref[...], preferred_element_type=jnp.float32)
    p = p * pl.reciprocal(denom, approx=True)
    ctx = mm(p, vblk_ref[...])                          # (B*S, H), lane-dense

    attn_out = mm(ctx, wo_ref[l]) + bo_ref[l]
    x = layer_norm(attn_out + x, ln1g_ref[l], ln1b_ref[l])

    # ---- feed-forward ----
    h1 = mm(x, wi_ref[l]) + bi_ref[l]
    # TODO(synk): HF RoBERTa uses exact erf-GELU; tanh approximation used here
    # for guaranteed Mosaic lowering.
    h1 = jax.nn.gelu(h1, approximate=True)
    h2 = mm(h1, wo2_ref[l]) + bo2_ref[l]
    x = layer_norm(h2 + x, ln2g_ref[l], ln2b_ref[l])
    x_ref[...] = x

    # ---- classification head, fused into the last layer step ----
    @pl.when(l == pl.num_programs(0) - 1)
    def _():
        # dense+tanh and out_proj are row-wise; compute over all B*S rows
        # (trivial extra FLOPs), store the full lane-dense padded slab and let
        # the wrapper pick the <s>-token rows (b*SEQ).
        hc = jnp.tanh(mm(x, clsw_ref[...]) + clsb_ref[...])     # (B*S, H)
        logits = mm(hc, outw_ref[...]) + outb_ref[...]          # (B*S, LOGIT_PAD)
        o_ref[...] = logits.astype(o_ref.dtype)


# ----------------------------- parameters -----------------------------
def init_params(key):
    def nrm(k, shape, scale=0.02):
        return scale * jax.random.normal(k, shape, dtype=jnp.float32)

    ks = iter(jax.random.split(key, 16))
    attn_scale = 1.0 / float(HEAD_DIM) ** 0.5

    wqkv = nrm(next(ks), (NUM_LAYERS, HIDDEN, 3 * HIDDEN))
    # fold 1/sqrt(head_dim) into the Q third of the fused QKV projection
    wqkv = wqkv.at[:, :, :HIDDEN].multiply(attn_scale)
    bqkv = jnp.zeros((NUM_LAYERS, 1, 3 * HIDDEN), jnp.float32)
    bqkv = bqkv.at[:, :, :HIDDEN].multiply(attn_scale)

    out_w = nrm(next(ks), (HIDDEN, NUM_LABELS))
    out_w = jnp.pad(out_w, ((0, 0), (0, LOGIT_PAD - NUM_LABELS)))

    params = {
        # embeddings (gathered in plain JAX, stay f32)
        "word_emb": nrm(next(ks), (VOCAB, HIDDEN)),
        "pos_emb": nrm(next(ks), (MAX_POS, HIDDEN)),
        "type_emb": nrm(next(ks), (1, HIDDEN)),
        "emb_ln_g": jnp.ones((1, HIDDEN), jnp.float32),
        "emb_ln_b": jnp.zeros((1, HIDDEN), jnp.float32),
        # per-layer weights stacked along a leading layer axis.
        # Matmul weights pre-cast to bf16 in HBM; biases / LN params stay f32.
        "wqkv": wqkv.astype(jnp.bfloat16),
        "bqkv": bqkv,
        "wo": nrm(next(ks), (NUM_LAYERS, HIDDEN, HIDDEN)).astype(jnp.bfloat16),
        "bo": jnp.zeros((NUM_LAYERS, 1, HIDDEN), jnp.float32),
        "ln1_g": jnp.ones((NUM_LAYERS, 1, HIDDEN), jnp.float32),
        "ln1_b": jnp.zeros((NUM_LAYERS, 1, HIDDEN), jnp.float32),
        "wi": nrm(next(ks), (NUM_LAYERS, HIDDEN, FFN)).astype(jnp.bfloat16),
        "bi": jnp.zeros((NUM_LAYERS, 1, FFN), jnp.float32),
        "wo2": nrm(next(ks), (NUM_LAYERS, FFN, HIDDEN)).astype(jnp.bfloat16),
        "bo2": jnp.zeros((NUM_LAYERS, 1, HIDDEN), jnp.float32),
        "ln2_g": jnp.ones((NUM_LAYERS, 1, HIDDEN), jnp.float32),
        "ln2_b": jnp.zeros((NUM_LAYERS, 1, HIDDEN), jnp.float32),
        # classification head; out_proj padded to 128 lanes (zero columns)
        "cls_w": nrm(next(ks), (HIDDEN, HIDDEN)).astype(jnp.bfloat16),
        "cls_b": jnp.zeros((1, HIDDEN), jnp.float32),
        "out_w": out_w.astype(jnp.bfloat16),
        "out_b": jnp.zeros((1, LOGIT_PAD), jnp.float32),
    }
    return params


# ----------------------------- forward -----------------------------
def roberta_pair_forward(params, word, mask):
    """Equivalent of RobertaPAIRSentenceEncoder.forward -> logits (B, 2)."""
    B, S = word.shape
    assert B == BATCH and S == SEQ

    # --- embeddings (gathers = plain-JAX glue) ---
    not_pad = (word != PAD_ID).astype(jnp.int32)
    position_ids = jnp.cumsum(not_pad, axis=1) * not_pad + PAD_ID  # roberta style
    emb = (params["word_emb"][word]
           + params["pos_emb"][position_ids]
           + params["type_emb"][0][None, None, :]).astype(jnp.float32)   # (B, S, H)
    emb2d = emb.reshape(BS_TOK, HIDDEN)                                  # batch folded

    # --- packed additive attention bias: (B*S, NUM_HEADS*B*S) ---
    # key-padding bias (HF convention: (1 - mask) * -10000) plus a block mask
    # that forbids cross-batch attention now that batch is folded into rows.
    maskf = mask.astype(jnp.float32).reshape(BS_TOK)
    key_bias = (1.0 - maskf) * -10000.0                                   # (B*S,)
    batch_id = jnp.repeat(jnp.arange(BATCH), SEQ)                         # (B*S,)
    cross = jnp.where(batch_id[:, None] == batch_id[None, :], 0.0, -10000.0)
    bias_bs = cross + key_bias[None, :]                                   # (B*S, B*S)
    bias_packed = jnp.tile(bias_bs, (1, NUM_HEADS))                       # (B*S, NHBS)

    # block-diagonal ones matrix used to broadcast per-head softmax denominators
    hid = jnp.arange(NHBS) // BS_TOK
    ones_blk = (hid[:, None] == hid[None, :]).astype(jnp.float32)         # (NHBS, NHBS)

    const2 = lambda l: (0, 0)
    const3 = lambda l: (0, 0, 0)

    in_specs = [
        pl.BlockSpec((BS_TOK, HIDDEN), const2),                 # emb (folded)
        pl.BlockSpec((BS_TOK, NHBS), const2),                   # packed mask bias
        pl.BlockSpec((NHBS, NHBS), const2),                     # block-ones
        pl.BlockSpec((1, HIDDEN), const2),                      # emb_ln_g
        pl.BlockSpec((1, HIDDEN), const2),                      # emb_ln_b
        # all per-layer params resident: full arrays, constant index maps
        pl.BlockSpec((NUM_LAYERS, HIDDEN, 3 * HIDDEN), const3),  # wqkv (bf16)
        pl.BlockSpec((NUM_LAYERS, 1, 3 * HIDDEN), const3),       # bqkv
        pl.BlockSpec((NUM_LAYERS, HIDDEN, HIDDEN), const3),      # wo (bf16)
        pl.BlockSpec((NUM_LAYERS, 1, HIDDEN), const3),           # bo
        pl.BlockSpec((NUM_LAYERS, 1, HIDDEN), const3),           # ln1_g
        pl.BlockSpec((NUM_LAYERS, 1, HIDDEN), const3),           # ln1_b
        pl.BlockSpec((NUM_LAYERS, HIDDEN, FFN), const3),         # wi (bf16)
        pl.BlockSpec((NUM_LAYERS, 1, FFN), const3),              # bi
        pl.BlockSpec((NUM_LAYERS, FFN, HIDDEN), const3),         # wo2 (bf16)
        pl.BlockSpec((NUM_LAYERS, 1, HIDDEN), const3),           # bo2
        pl.BlockSpec((NUM_LAYERS, 1, HIDDEN), const3),           # ln2_g
        pl.BlockSpec((NUM_LAYERS, 1, HIDDEN), const3),           # ln2_b
        pl.BlockSpec((HIDDEN, HIDDEN), const2),                  # cls_w (bf16)
        pl.BlockSpec((1, HIDDEN), const2),                       # cls_b
        pl.BlockSpec((HIDDEN, LOGIT_PAD), const2),               # out_w (bf16, padded)
        pl.BlockSpec((1, LOGIT_PAD), const2),                    # out_b (padded)
    ]

    logits_padded = pl.pallas_call(
        _model_kernel,
        out_shape=jax.ShapeDtypeStruct((BS_TOK, LOGIT_PAD), jnp.float32),
        grid=(NUM_LAYERS,),
        in_specs=in_specs,
        out_specs=pl.BlockSpec((BS_TOK, LOGIT_PAD), const2),
        scratch_shapes=[
            pltpu.VMEM((BS_TOK, HIDDEN), jnp.float32),     # resident activations
            pltpu.VMEM((NHBS, HIDDEN), jnp.bfloat16),      # block-diag packed K
            pltpu.VMEM((NHBS, HIDDEN), jnp.bfloat16),      # block-diag packed V
        ],
        compiler_params=pltpu.CompilerParams(
            dimension_semantics=("arbitrary",)),
    )(emb2d, bias_packed, ones_blk,
      params["emb_ln_g"], params["emb_ln_b"],
      params["wqkv"], params["bqkv"], params["wo"], params["bo"],
      params["ln1_g"], params["ln1_b"],
      params["wi"], params["bi"], params["wo2"], params["bo2"],
      params["ln2_g"], params["ln2_b"],
      params["cls_w"], params["cls_b"], params["out_w"], params["out_b"])

    # <s> token of batch b lives at row b*SEQ; keep the real label lanes.
    return logits_padded[::SEQ, :NUM_LABELS]


# ----------------------------- main -----------------------------
if __name__ == "__main__":
    key = jax.random.PRNGKey(0)
    pkey, wkey = jax.random.split(key)
    params = init_params(pkey)

    # deterministic token ids (avoid pad id inside real tokens), mask w/ padding
    word = jax.random.randint(wkey, (BATCH, SEQ), 2, VOCAB, dtype=jnp.int32)
    word = word.at[:, 0].set(0)                 # <s> token
    word = word.at[1, SEQ - 4:].set(PAD_ID)     # pad tail of second example
    mask = jnp.ones((BATCH, SEQ), dtype=jnp.int32)
    mask = mask.at[1, SEQ - 4:].set(0)

    logits = jax.jit(roberta_pair_forward)(params, word, mask)
    logits = jax.block_until_ready(logits)

    assert logits.shape == (BATCH, NUM_LABELS)
    assert bool(jnp.all(jnp.isfinite(logits)))
    # TODO(synk): `tokenize()` is host-side string processing (RobertaTokenizer);
    # it has no device-kernel equivalent and is not implemented here.
    print("KERNEL_OK")
</pallas_src>

<mosaic_0001>
module attributes {stable_mosaic.version = 11 : i64} {
  func.func @_model_kernel(%arg0: i32, %arg1: memref<32x128xf32, #tpu.memory_space<vmem>>, %arg2: memref<32x128xf32, #tpu.memory_space<vmem>>, %arg3: memref<128x128xf32, #tpu.memory_space<vmem>>, %arg4: memref<1x128xf32, #tpu.memory_space<vmem>>, %arg5: memref<1x128xf32, #tpu.memory_space<vmem>>, %arg6: memref<2x128x384xbf16, #tpu.memory_space<vmem>>, %arg7: memref<2x1x384xf32, #tpu.memory_space<vmem>>, %arg8: memref<2x128x128xbf16, #tpu.memory_space<vmem>>, %arg9: memref<2x1x128xf32, #tpu.memory_space<vmem>>, %arg10: memref<2x1x128xf32, #tpu.memory_space<vmem>>, %arg11: memref<2x1x128xf32, #tpu.memory_space<vmem>>, %arg12: memref<2x128x256xbf16, #tpu.memory_space<vmem>>, %arg13: memref<2x1x256xf32, #tpu.memory_space<vmem>>, %arg14: memref<2x256x128xbf16, #tpu.memory_space<vmem>>, %arg15: memref<2x1x128xf32, #tpu.memory_space<vmem>>, %arg16: memref<2x1x128xf32, #tpu.memory_space<vmem>>, %arg17: memref<2x1x128xf32, #tpu.memory_space<vmem>>, %arg18: memref<128x128xbf16, #tpu.memory_space<vmem>>, %arg19: memref<1x128xf32, #tpu.memory_space<vmem>>, %arg20: memref<128x128xbf16, #tpu.memory_space<vmem>>, %arg21: memref<1x128xf32, #tpu.memory_space<vmem>>, %arg22: memref<32x128xf32, #tpu.memory_space<vmem>>, %arg23: memref<32x128xf32, #tpu.memory_space<vmem>>, %arg24: memref<128x128xbf16, #tpu.memory_space<vmem>>, %arg25: memref<128x128xbf16, #tpu.memory_space<vmem>>) attributes {dimension_semantics = [#tpu.dimension_semantics<arbitrary>], iteration_bounds = array<i64: 2>, scalar_prefetch = 0 : i64, scratch_operands = 3 : i64, tpu.core_type = #tpu.core_type<tc>, window_params = [{pipeline_mode = #tpu.pipeline_mode<synchronous>, transform_indices = @transform_0, window_bounds = array<i64: 32, 128>}, {pipeline_mode = #tpu.pipeline_mode<synchronous>, transform_indices = @transform_1, window_bounds = array<i64: 32, 128>}, {pipeline_mode = #tpu.pipeline_mode<synchronous>, transform_indices = @transform_2, window_bounds = array<i64: 128, 128>}, {pipeline_mode = #tpu.pipeline_mode<synchronous>, transform_indices = @transform_3, window_bounds = array<i64: 1, 128>}, {pipeline_mode = #tpu.pipeline_mode<synchronous>, transform_indices = @transform_4, window_bounds = array<i64: 1, 128>}, {pipeline_mode = #tpu.pipeline_mode<synchronous>, transform_indices = @transform_5, window_bounds = array<i64: 2, 128, 384>}, {pipeline_mode = #tpu.pipeline_mode<synchronous>, transform_indices = @transform_6, window_bounds = array<i64: 2, 1, 384>}, {pipeline_mode = #tpu.pipeline_mode<synchronous>, transform_indices = @transform_7, window_bounds = array<i64: 2, 128, 128>}, {pipeline_mode = #tpu.pipeline_mode<synchronous>, transform_indices = @transform_8, window_bounds = array<i64: 2, 1, 128>}, {pipeline_mode = #tpu.pipeline_mode<synchronous>, transform_indices = @transform_9, window_bounds = array<i64: 2, 1, 128>}, {pipeline_mode = #tpu.pipeline_mode<synchronous>, transform_indices = @transform_10, window_bounds = array<i64: 2, 1, 128>}, {pipeline_mode = #tpu.pipeline_mode<synchronous>, transform_indices = @transform_11, window_bounds = array<i64: 2, 128, 256>}, {pipeline_mode = #tpu.pipeline_mode<synchronous>, transform_indices = @transform_12, window_bounds = array<i64: 2, 1, 256>}, {pipeline_mode = #tpu.pipeline_mode<synchronous>, transform_indices = @transform_13, window_bounds = array<i64: 2, 256, 128>}, {pipeline_mode = #tpu.pipeline_mode<synchronous>, transform_indices = @transform_14, window_bounds = array<i64: 2, 1, 128>}, {pipeline_mode = #tpu.pipeline_mode<synchronous>, transform_indices = @transform_15, window_bounds = array<i64: 2, 1, 128>}, {pipeline_mode = #tpu.pipeline_mode<synchronous>, transform_indices = @transform_16, window_bounds = array<i64: 2, 1, 128>}, {pipeline_mode = #tpu.pipeline_mode<synchronous>, transform_indices = @transform_17, window_bounds = array<i64: 128, 128>}, {pipeline_mode = #tpu.pipeline_mode<synchronous>, transform_indices = @transform_18, window_bounds = array<i64: 1, 128>}, {pipeline_mode = #tpu.pipeline_mode<synchronous>, transform_indices = @transform_19, window_bounds = array<i64: 128, 128>}, {pipeline_mode = #tpu.pipeline_mode<synchronous>, transform_indices = @transform_20, window_bounds = array<i64: 1, 128>}, {pipeline_mode = #tpu.pipeline_mode<synchronous>, transform_indices = @transform_21, window_bounds = array<i64: 32, 128>}]} {
    %c0_i32 = arith.constant 0 : i32
    %0 = arith.cmpi eq, %arg0, %c0_i32 : i32
    %1 = arith.extui %0 : i1 to i32
    %c0_i32_0 = arith.constant 0 : i32
    %2 = arith.cmpi ne, %1, %c0_i32_0 : i32
    scf.if %2 {
      %c0_71 = arith.constant 0 : index
      %c0_72 = arith.constant 0 : index
      %161 = vector.load %arg1[%c0_71, %c0_72] : memref<32x128xf32, #tpu.memory_space<vmem>>, vector<32x128xf32>
      %c0_73 = arith.constant 0 : index
      %c0_74 = arith.constant 0 : index
      %162 = vector.load %arg4[%c0_73, %c0_74] : memref<1x128xf32, #tpu.memory_space<vmem>>, vector<1x128xf32>
      %c0_75 = arith.constant 0 : index
      %c0_76 = arith.constant 0 : index
      %163 = vector.load %arg5[%c0_75, %c0_76] : memref<1x128xf32, #tpu.memory_space<vmem>>, vector<1x128xf32>
      %cst_77 = arith.constant dense<0.000000e+00> : vector<32xf32>
      %164 = vector.multi_reduction <add>, %161, %cst_77 [1] : vector<32x128xf32> to vector<32xf32>
      %165 = vector.shape_cast %164 : vector<32xf32> to vector<32x1xf32>
      %cst_78 = arith.constant 1.280000e+02 : f32
      %166 = vector.broadcast %cst_78 : f32 to vector<32x1xf32>
      %167 = arith.divf %165, %166 : vector<32x1xf32>
      %168 = arith.mulf %161, %161 : vector<32x128xf32>
      %cst_79 = arith.constant dense<0.000000e+00> : vector<32xf32>
      %169 = vector.multi_reduction <add>, %168, %cst_79 [1] : vector<32x128xf32> to vector<32xf32>
      %170 = vector.shape_cast %169 : vector<32xf32> to vector<32x1xf32>
      %cst_80 = arith.constant 1.280000e+02 : f32
      %171 = vector.broadcast %cst_80 : f32 to vector<32x1xf32>
      %172 = arith.divf %170, %171 : vector<32x1xf32>
      %173 = arith.mulf %167, %167 : vector<32x1xf32>
      %174 = arith.subf %172, %173 : vector<32x1xf32>
      %175 = vector.broadcast %167 : vector<32x1xf32> to vector<32x128xf32>
      %176 = arith.subf %161, %175 : vector<32x128xf32>
      %cst_81 = arith.constant 9.99999974E-6 : f32
      %177 = vector.broadcast %cst_81 : f32 to vector<32x1xf32>
      %178 = arith.addf %174, %177 : vector<32x1xf32>
      %179 = math.rsqrt %178 : vector<32x1xf32>
      %180 = vector.broadcast %179 : vector<32x1xf32> to vector<32x128xf32>
      %181 = arith.mulf %176, %180 : vector<32x128xf32>
      %182 = vector.broadcast %162 : vector<1x128xf32> to vector<32x128xf32>
      %183 = arith.mulf %181, %182 : vector<32x128xf32>
      %184 = vector.broadcast %163 : vector<1x128xf32> to vector<32x128xf32>
      %185 = arith.addf %183, %184 : vector<32x128xf32>
      %c0_82 = arith.constant 0 : index
      %c0_83 = arith.constant 0 : index
      %186 = vector.load %arg23[%c0_82, %c0_83] : memref<32x128xf32, #tpu.memory_space<vmem>>, vector<32x128xf32>
      tpu.vector_store %arg23[%c0_82, %c0_83], %185 {strides = array<i32>} : memref<32x128xf32, #tpu.memory_space<vmem>>, vector<32x128xf32>,
      %cst_84 = arith.constant 0.000000e+00 : bf16
      %187 = vector.broadcast %cst_84 : bf16 to vector<128x128xbf16>
      %c0_85 = arith.constant 0 : index
      %c0_86 = arith.constant 0 : index
      %188 = vector.load %arg24[%c0_85, %c0_86] : memref<128x128xbf16, #tpu.memory_space<vmem>>, vector<128x128xbf16>
      tpu.vector_store %arg24[%c0_85, %c0_86], %187 {strides = array<i32>} : memref<128x128xbf16, #tpu.memory_space<vmem>>, vector<128x128xbf16>,
      %cst_87 = arith.constant 0.000000e+00 : bf16
      %189 = vector.broadcast %cst_87 : bf16 to vector<128x128xbf16>
      %c0_88 = arith.constant 0 : index
      %c0_89 = arith.constant 0 : index
      %190 = vector.load %arg25[%c0_88, %c0_89] : memref<128x128xbf16, #tpu.memory_space<vmem>>, vector<128x128xbf16>
      tpu.vector_store %arg25[%c0_88, %c0_89], %189 {strides = array<i32>} : memref<128x128xbf16, #tpu.memory_space<vmem>>, vector<128x128xbf16>,
    } else {
    }
    %c0 = arith.constant 0 : index
    %c0_1 = arith.constant 0 : index
    %3 = vector.load %arg23[%c0, %c0_1] : memref<32x128xf32, #tpu.memory_space<vmem>>, vector<32x128xf32>
    %c0_2 = arith.constant 0 : index
    %c0_3 = arith.constant 0 : index
    %4 = vector.load %arg2[%c0_2, %c0_3] : memref<32x128xf32, #tpu.memory_space<vmem>>, vector<32x128xf32>
    %5 = arith.index_cast %arg0 : i32 to index
    %c0_4 = arith.constant 0 : index
    %c0_5 = arith.constant 0 : index
    %6 = vector.load %arg6[%5, %c0_4, %c0_5] : memref<2x128x384xbf16, #tpu.memory_space<vmem>>, vector<1x128x384xbf16>
    %7 = vector.shape_cast %6 : vector<1x128x384xbf16> to vector<128x384xbf16>
    %8 = arith.truncf %3 : vector<32x128xf32> to vector<32x128xbf16>
    %cst = arith.constant dense<0.000000e+00> : vector<32x384xf32>
    %9 = tpu.matmul %8, %7, %cst {dimension_numbers = #tpu.dot_dimension_numbers<[1], [0], [0], [1], [0, 0, 1, 1], [], []>} : vector<32x128xbf16>, vector<128x384xbf16>, vector<32x384xf32> -> vector<32x384xf32>
    %10 = arith.index_cast %arg0 : i32 to index
    %c0_6 = arith.constant 0 : index
    %c0_7 = arith.constant 0 : index
    %11 = vector.load %arg7[%10, %c0_6, %c0_7] : memref<2x1x384xf32, #tpu.memory_space<vmem>>, vector<1x1x384xf32>
    %12 = vector.shape_cast %11 : vector<1x1x384xf32> to vector<1x384xf32>
    %13 = vector.broadcast %12 : vector<1x384xf32> to vector<32x384xf32>
    %14 = arith.addf %9, %13 : vector<32x384xf32>
    %15 = vector.extract_strided_slice %14 {offsets = [0, 128], sizes = [32, 32], strides = [1, 1]} : vector<32x384xf32> to vector<32x32xf32>
    %16 = arith.truncf %15 : vector<32x32xf32> to vector<32x32xbf16>
    %c0_8 = arith.constant 0 : index
    %c0_9 = arith.constant 0 : index
    %17 = vector.load %arg24[%c0_8, %c0_9] : memref<128x128xbf16, #tpu.memory_space<vmem>>, vector<32x32xbf16>
    tpu.vector_store %arg24[%c0_8, %c0_9], %16 {strides = array<i32>} : memref<128x128xbf16, #tpu.memory_space<vmem>>, vector<32x32xbf16>,
    %18 = vector.extract_strided_slice %14 {offsets = [0, 256], sizes = [32, 32], strides = [1, 1]} : vector<32x384xf32> to vector<32x32xf32>
    %19 = arith.truncf %18 : vector<32x32xf32> to vector<32x32xbf16>
    %c0_10 = arith.constant 0 : index
    %c0_11 = arith.constant 0 : index
    %20 = vector.load %arg25[%c0_10, %c0_11] : memref<128x128xbf16, #tpu.memory_space<vmem>>, vector<32x32xbf16>
    tpu.vector_store %arg25[%c0_10, %c0_11], %19 {strides = array<i32>} : memref<128x128xbf16, #tpu.memory_space<vmem>>, vector<32x32xbf16>,
    %21 = vector.extract_strided_slice %14 {offsets = [0, 160], sizes = [32, 32], strides = [1, 1]} : vector<32x384xf32> to vector<32x32xf32>
    %22 = arith.truncf %21 : vector<32x32xf32> to vector<32x32xbf16>
    %c32 = arith.constant 32 : index
    %c32_12 = arith.constant 32 : index
    %23 = vector.load %arg24[%c32, %c32_12] : memref<128x128xbf16, #tpu.memory_space<vmem>>, vector<32x32xbf16>
    tpu.vector_store %arg24[%c32, %c32_12], %22 {strides = array<i32>} : memref<128x128xbf16, #tpu.memory_space<vmem>>, vector<32x32xbf16>,
    %24 = vector.extract_strided_slice %14 {offsets = [0, 288], sizes = [32, 32], strides = [1, 1]} : vector<32x384xf32> to vector<32x32xf32>
    %25 = arith.truncf %24 : vector<32x32xf32> to vector<32x32xbf16>
    %c32_13 = arith.constant 32 : index
    %c32_14 = arith.constant 32 : index
    %26 = vector.load %arg25[%c32_13, %c32_14] : memref<128x128xbf16, #tpu.memory_space<vmem>>, vector<32x32xbf16>
    tpu.vector_store %arg25[%c32_13, %c32_14], %25 {strides = array<i32>} : memref<128x128xbf16, #tpu.memory_space<vmem>>, vector<32x32xbf16>,
    %27 = vector.extract_strided_slice %14 {offsets = [0, 192], sizes = [32, 32], strides = [1, 1]} : vector<32x384xf32> to vector<32x32xf32>
    %28 = arith.truncf %27 : vector<32x32xf32> to vector<32x32xbf16>
    %c64 = arith.constant 64 : index
    %c64_15 = arith.constant 64 : index
    %29 = vector.load %arg24[%c64, %c64_15] : memref<128x128xbf16, #tpu.memory_space<vmem>>, vector<32x32xbf16>
    tpu.vector_store %arg24[%c64, %c64_15], %28 {strides = array<i32>} : memref<128x128xbf16, #tpu.memory_space<vmem>>, vector<32x32xbf16>,
    %30 = vector.extract_strided_slice %14 {offsets = [0, 320], sizes = [32, 32], strides = [1, 1]} : vector<32x384xf32> to vector<32x32xf32>
    %31 = arith.truncf %30 : vector<32x32xf32> to vector<32x32xbf16>
    %c64_16 = arith.constant 64 : index
    %c64_17 = arith.constant 64 : index
    %32 = vector.load %arg25[%c64_16, %c64_17] : memref<128x128xbf16, #tpu.memory_space<vmem>>, vector<32x32xbf16>
    tpu.vector_store %arg25[%c64_16, %c64_17], %31 {strides = array<i32>} : memref<128x128xbf16, #tpu.memory_space<vmem>>, vector<32x32xbf16>,
    %33 = vector.extract_strided_slice %14 {offsets = [0, 224], sizes = [32, 32], strides = [1, 1]} : vector<32x384xf32> to vector<32x32xf32>
    %34 = arith.truncf %33 : vector<32x32xf32> to vector<32x32xbf16>
    %c96 = arith.constant 96 : index
    %c96_18 = arith.constant 96 : index
    %35 = vector.load %arg24[%c96, %c96_18] : memref<128x128xbf16, #tpu.memory_space<vmem>>, vector<32x32xbf16>
    tpu.vector_store %arg24[%c96, %c96_18], %34 {strides = array<i32>} : memref<128x128xbf16, #tpu.memory_space<vmem>>, vector<32x32xbf16>,
    %36 = vector.extract_strided_slice %14 {offsets = [0, 352], sizes = [32, 32], strides = [1, 1]} : vector<32x384xf32> to vector<32x32xf32>
    %37 = arith.truncf %36 : vector<32x32xf32> to vector<32x32xbf16>
    %c96_19 = arith.constant 96 : index
    %c96_20 = arith.constant 96 : index
    %38 = vector.load %arg25[%c96_19, %c96_20] : memref<128x128xbf16, #tpu.memory_space<vmem>>, vector<32x32xbf16>
    tpu.vector_store %arg25[%c96_19, %c96_20], %37 {strides = array<i32>} : memref<128x128xbf16, #tpu.memory_space<vmem>>, vector<32x32xbf16>,
    %39 = vector.extract_strided_slice %14 {offsets = [0, 0], sizes = [32, 128], strides = [1, 1]} : vector<32x384xf32> to vector<32x128xf32>
    %40 = arith.truncf %39 : vector<32x128xf32> to vector<32x128xbf16>
    %c0_21 = arith.constant 0 : index
    %c0_22 = arith.constant 0 : index
    %41 = vector.load %arg24[%c0_21, %c0_22] : memref<128x128xbf16, #tpu.memory_space<vmem>>, vector<128x128xbf16>
    %cst_23 = arith.constant dense<0.000000e+00> : vector<32x128xf32>
    %42 = tpu.matmul %40, %41, %cst_23 {dimension_numbers = #tpu.dot_dimension_numbers<[1], [1], [0], [0], [0, 0, 1, 0], [], []>} : vector<32x128xbf16>, vector<128x128xbf16>, vector<32x128xf32> -> vector<32x128xf32>
    %43 = arith.addf %42, %4 : vector<32x128xf32>
    %cst_24 = arith.constant dense<0xFF800000> : vector<32xf32>
    %44 = vector.multi_reduction <maximumf>, %43, %cst_24 [1] : vector<32x128xf32> to vector<32xf32>
    %45 = vector.shape_cast %44 : vector<32xf32> to vector<32x1xf32>
    %46 = vector.broadcast %45 : vector<32x1xf32> to vector<32x128xf32>
    %47 = arith.subf %43, %46 : vector<32x128xf32>
    %48 = math.exp %47 : vector<32x128xf32>
    %c0_25 = arith.constant 0 : index
    %c0_26 = arith.constant 0 : index
    %49 = vector.load %arg3[%c0_25, %c0_26] : memref<128x128xf32, #tpu.memory_space<vmem>>, vector<128x128xf32>
    %cst_27 = arith.constant dense<0.000000e+00> : vector<32x128xf32>
    %50 = tpu.matmul %48, %49, %cst_27 {dimension_numbers = #tpu.dot_dimension_numbers<[1], [0], [0], [1], [0, 0, 1, 1], [], []>} : vector<32x128xf32>, vector<128x128xf32>, vector<32x128xf32> -> vector<32x128xf32>
    %51 = tpu.reciprocal %50 {approx = true} : vector<32x128xf32> -> vector<32x128xf32>
    %52 = arith.mulf %48, %51 : vector<32x128xf32>
    %c0_28 = arith.constant 0 : index
    %c0_29 = arith.constant 0 : index
    %53 = vector.load %arg25[%c0_28, %c0_29] : memref<128x128xbf16, #tpu.memory_space<vmem>>, vector<128x128xbf16>
    %54 = arith.truncf %52 : vector<32x128xf32> to vector<32x128xbf16>
    %cst_30 = arith.constant dense<0.000000e+00> : vector<32x128xf32>
    %55 = tpu.matmul %54, %53, %cst_30 {dimension_numbers = #tpu.dot_dimension_numbers<[1], [0], [0], [1], [0, 0, 1, 1], [], []>} : vector<32x128xbf16>, vector<128x128xbf16>, vector<32x128xf32> -> vector<32x128xf32>
    %56 = arith.index_cast %arg0 : i32 to index
    %c0_31 = arith.constant 0 : index
    %c0_32 = arith.constant 0 : index
    %57 = vector.load %arg8[%56, %c0_31, %c0_32] : memref<2x128x128xbf16, #tpu.memory_space<vmem>>, vector<1x128x128xbf16>
    %58 = vector.shape_cast %57 : vector<1x128x128xbf16> to vector<128x128xbf16>
    %59 = arith.truncf %55 : vector<32x128xf32> to vector<32x128xbf16>
    %cst_33 = arith.constant dense<0.000000e+00> : vector<32x128xf32>
    %60 = tpu.matmul %59, %58, %cst_33 {dimension_numbers = #tpu.dot_dimension_numbers<[1], [0], [0], [1], [0, 0, 1, 1], [], []>} : vector<32x128xbf16>, vector<128x128xbf16>, vector<32x128xf32> -> vector<32x128xf32>
    %61 = arith.index_cast %arg0 : i32 to index
    %c0_34 = arith.constant 0 : index
    %c0_35 = arith.constant 0 : index
    %62 = vector.load %arg9[%61, %c0_34, %c0_35] : memref<2x1x128xf32, #tpu.memory_space<vmem>>, vector<1x1x128xf32>
    %63 = vector.shape_cast %62 : vector<1x1x128xf32> to vector<1x128xf32>
    %64 = vector.broadcast %63 : vector<1x128xf32> to vector<32x128xf32>
    %65 = arith.addf %60, %64 : vector<32x128xf32>
    %66 = arith.addf %65, %3 : vector<32x128xf32>
    %67 = arith.index_cast %arg0 : i32 to index
    %c0_36 = arith.constant 0 : index
    %c0_37 = arith.constant 0 : index
    %68 = vector.load %arg10[%67, %c0_36, %c0_37] : memref<2x1x128xf32, #tpu.memory_space<vmem>>, vector<1x1x128xf32>
    %69 = vector.shape_cast %68 : vector<1x1x128xf32> to vector<1x128xf32>
    %70 = arith.index_cast %arg0 : i32 to index
    %c0_38 = arith.constant 0 : index
    %c0_39 = arith.constant 0 : index
    %71 = vector.load %arg11[%70, %c0_38, %c0_39] : memref<2x1x128xf32, #tpu.memory_space<vmem>>, vector<1x1x128xf32>
    %72 = vector.shape_cast %71 : vector<1x1x128xf32> to vector<1x128xf32>
    %cst_40 = arith.constant dense<0.000000e+00> : vector<32xf32>
    %73 = vector.multi_reduction <add>, %66, %cst_40 [1] : vector<32x128xf32> to vector<32xf32>
    %74 = vector.shape_cast %73 : vector<32xf32> to vector<32x1xf32>
    %cst_41 = arith.constant 1.280000e+02 : f32
    %75 = vector.broadcast %cst_41 : f32 to vector<32x1xf32>
    %76 = arith.divf %74, %75 : vector<32x1xf32>
    %77 = arith.mulf %66, %66 : vector<32x128xf32>
    %cst_42 = arith.constant dense<0.000000e+00> : vector<32xf32>
    %78 = vector.multi_reduction <add>, %77, %cst_42 [1] : vector<32x128xf32> to vector<32xf32>
    %79 = vector.shape_cast %78 : vector<32xf32> to vector<32x1xf32>
    %cst_43 = arith.constant 1.280000e+02 : f32
    %80 = vector.broadcast %cst_43 : f32 to vector<32x1xf32>
    %81 = arith.divf %79, %80 : vector<32x1xf32>
    %82 = arith.mulf %76, %76 : vector<32x1xf32>
    %83 = arith.subf %81, %82 : vector<32x1xf32>
    %84 = vector.broadcast %76 : vector<32x1xf32> to vector<32x128xf32>
    %85 = arith.subf %66, %84 : vector<32x128xf32>
    %cst_44 = arith.constant 9.99999974E-6 : f32
    %86 = vector.broadcast %cst_44 : f32 to vector<32x1xf32>
    %87 = arith.addf %83, %86 : vector<32x1xf32>
    %88 = math.rsqrt %87 : vector<32x1xf32>
    %89 = vector.broadcast %88 : vector<32x1xf32> to vector<32x128xf32>
    %90 = arith.mulf %85, %89 : vector<32x128xf32>
    %91 = vector.broadcast %69 : vector<1x128xf32> to vector<32x128xf32>
    %92 = arith.mulf %90, %91 : vector<32x128xf32>
    %93 = vector.broadcast %72 : vector<1x128xf32> to vector<32x128xf32>
    %94 = arith.addf %92, %93 : vector<32x128xf32>
    %95 = arith.index_cast %arg0 : i32 to index
    %c0_45 = arith.constant 0 : index
    %c0_46 = arith.constant 0 : index
    %96 = vector.load %arg12[%95, %c0_45, %c0_46] : memref<2x128x256xbf16, #tpu.memory_space<vmem>>, vector<1x128x256xbf16>
    %97 = vector.shape_cast %96 : vector<1x128x256xbf16> to vector<128x256xbf16>
    %98 = arith.truncf %94 : vector<32x128xf32> to vector<32x128xbf16>
    %cst_47 = arith.constant dense<0.000000e+00> : vector<32x256xf32>
    %99 = tpu.matmul %98, %97, %cst_47 {dimension_numbers = #tpu.dot_dimension_numbers<[1], [0], [0], [1], [0, 0, 1, 1], [], []>} : vector<32x128xbf16>, vector<128x256xbf16>, vector<32x256xf32> -> vector<32x256xf32>
    %100 = arith.index_cast %arg0 : i32 to index
    %c0_48 = arith.constant 0 : index
    %c0_49 = arith.constant 0 : index
    %101 = vector.load %arg13[%100, %c0_48, %c0_49] : memref<2x1x256xf32, #tpu.memory_space<vmem>>, vector<1x1x256xf32>
    %102 = vector.shape_cast %101 : vector<1x1x256xf32> to vector<1x256xf32>
    %103 = vector.broadcast %102 : vector<1x256xf32> to vector<32x256xf32>
    %104 = arith.addf %99, %103 : vector<32x256xf32>
    %105 = arith.mulf %104, %104 : vector<32x256xf32>
    %106 = arith.mulf %104, %105 : vector<32x256xf32>
    %cst_50 = arith.constant 4.471500e-02 : f32
    %107 = vector.broadcast %cst_50 : f32 to vector<32x256xf32>
    %108 = arith.mulf %107, %106 : vector<32x256xf32>
    %109 = arith.addf %104, %108 : vector<32x256xf32>
    %cst_51 = arith.constant 0.797884583 : f32
    %110 = vector.broadcast %cst_51 : f32 to vector<32x256xf32>
    %111 = arith.mulf %110, %109 : vector<32x256xf32>
    %112 = math.tanh %111 : vector<32x256xf32>
    %cst_52 = arith.constant 1.000000e+00 : f32
    %113 = vector.broadcast %cst_52 : f32 to vector<32x256xf32>
    %114 = arith.addf %113, %112 : vector<32x256xf32>
    %cst_53 = arith.constant 5.000000e-01 : f32
    %115 = vector.broadcast %cst_53 : f32 to vector<32x256xf32>
    %116 = arith.mulf %115, %114 : vector<32x256xf32>
    %117 = arith.mulf %104, %116 : vector<32x256xf32>
    %118 = arith.index_cast %arg0 : i32 to index
    %c0_54 = arith.constant 0 : index
    %c0_55 = arith.constant 0 : index
    %119 = vector.load %arg14[%118, %c0_54, %c0_55] : memref<2x256x128xbf16, #tpu.memory_space<vmem>>, vector<1x256x128xbf16>
    %120 = vector.shape_cast %119 : vector<1x256x128xbf16> to vector<256x128xbf16>
    %121 = arith.truncf %117 : vector<32x256xf32> to vector<32x256xbf16>
    %cst_56 = arith.constant dense<0.000000e+00> : vector<32x128xf32>
    %122 = tpu.matmul %121, %120, %cst_56 {dimension_numbers = #tpu.dot_dimension_numbers<[1], [0], [0], [1], [0, 0, 1, 1], [], []>} : vector<32x256xbf16>, vector<256x128xbf16>, vector<32x128xf32> -> vector<32x128xf32>
    %123 = arith.index_cast %arg0 : i32 to index
    %c0_57 = arith.constant 0 : index
    %c0_58 = arith.constant 0 : index
    %124 = vector.load %arg15[%123, %c0_57, %c0_58] : memref<2x1x128xf32, #tpu.memory_space<vmem>>, vector<1x1x128xf32>
    %125 = vector.shape_cast %124 : vector<1x1x128xf32> to vector<1x128xf32>
    %126 = vector.broadcast %125 : vector<1x128xf32> to vector<32x128xf32>
    %127 = arith.addf %122, %126 : vector<32x128xf32>
    %128 = arith.addf %127, %94 : vector<32x128xf32>
    %129 = arith.index_cast %arg0 : i32 to index
    %c0_59 = arith.constant 0 : index
    %c0_60 = arith.constant 0 : index
    %130 = vector.load %arg16[%129, %c0_59, %c0_60] : memref<2x1x128xf32, #tpu.memory_space<vmem>>, vector<1x1x128xf32>
    %131 = vector.shape_cast %130 : vector<1x1x128xf32> to vector<1x128xf32>
    %132 = arith.index_cast %arg0 : i32 to index
    %c0_61 = arith.constant 0 : index
    %c0_62 = arith.constant 0 : index
    %133 = vector.load %arg17[%132, %c0_61, %c0_62] : memref<2x1x128xf32, #tpu.memory_space<vmem>>, vector<1x1x128xf32>
    %134 = vector.shape_cast %133 : vector<1x1x128xf32> to vector<1x128xf32>
    %cst_63 = arith.constant dense<0.000000e+00> : vector<32xf32>
    %135 = vector.multi_reduction <add>, %128, %cst_63 [1] : vector<32x128xf32> to vector<32xf32>
    %136 = vector.shape_cast %135 : vector<32xf32> to vector<32x1xf32>
    %cst_64 = arith.constant 1.280000e+02 : f32
    %137 = vector.broadcast %cst_64 : f32 to vector<32x1xf32>
    %138 = arith.divf %136, %137 : vector<32x1xf32>
    %139 = arith.mulf %128, %128 : vector<32x128xf32>
    %cst_65 = arith.constant dense<0.000000e+00> : vector<32xf32>
    %140 = vector.multi_reduction <add>, %139, %cst_65 [1] : vector<32x128xf32> to vector<32xf32>
    %141 = vector.shape_cast %140 : vector<32xf32> to vector<32x1xf32>
    %cst_66 = arith.constant 1.280000e+02 : f32
    %142 = vector.broadcast %cst_66 : f32 to vector<32x1xf32>
    %143 = arith.divf %141, %142 : vector<32x1xf32>
    %144 = arith.mulf %138, %138 : vector<32x1xf32>
    %145 = arith.subf %143, %144 : vector<32x1xf32>
    %146 = vector.broadcast %138 : vector<32x1xf32> to vector<32x128xf32>
    %147 = arith.subf %128, %146 : vector<32x128xf32>
    %cst_67 = arith.constant 9.99999974E-6 : f32
    %148 = vector.broadcast %cst_67 : f32 to vector<32x1xf32>
    %149 = arith.addf %145, %148 : vector<32x1xf32>
    %150 = math.rsqrt %149 : vector<32x1xf32>
    %151 = vector.broadcast %150 : vector<32x1xf32> to vector<32x128xf32>
    %152 = arith.mulf %147, %151 : vector<32x128xf32>
    %153 = vector.broadcast %131 : vector<1x128xf32> to vector<32x128xf32>
    %154 = arith.mulf %152, %153 : vector<32x128xf32>
    %155 = vector.broadcast %134 : vector<1x128xf32> to vector<32x128xf32>
    %156 = arith.addf %154, %155 : vector<32x128xf32>
    %c0_68 = arith.constant 0 : index
    %c0_69 = arith.constant 0 : index
    %157 = vector.load %arg23[%c0_68, %c0_69] : memref<32x128xf32, #tpu.memory_space<vmem>>, vector<32x128xf32>
    tpu.vector_store %arg23[%c0_68, %c0_69], %156 {strides = array<i32>} : memref<32x128xf32, #tpu.memory_space<vmem>>, vector<32x128xf32>,
    %c1_i32 = arith.constant 1 : i32
    %158 = arith.cmpi eq, %arg0, %c1_i32 : i32
    %159 = arith.extui %158 : i1 to i32
    %c0_i32_70 = arith.constant 0 : i32
    %160 = arith.cmpi ne, %159, %c0_i32_70 : i32
    scf.if %160 {
      %c0_71 = arith.constant 0 : index
      %c0_72 = arith.constant 0 : index
      %161 = vector.load %arg18[%c0_71, %c0_72] : memref<128x128xbf16, #tpu.memory_space<vmem>>, vector<128x128xbf16>
      %162 = arith.truncf %156 : vector<32x128xf32> to vector<32x128xbf16>
      %cst_73 = arith.constant dense<0.000000e+00> : vector<32x128xf32>
      %163 = tpu.matmul %162, %161, %cst_73 {dimension_numbers = #tpu.dot_dimension_numbers<[1], [0], [0], [1], [0, 0, 1, 1], [], []>} : vector<32x128xbf16>, vector<128x128xbf16>, vector<32x128xf32> -> vector<32x128xf32>
      %c0_74 = arith.constant 0 : index
      %c0_75 = arith.constant 0 : index
      %164 = vector.load %arg19[%c0_74, %c0_75] : memref<1x128xf32, #tpu.memory_space<vmem>>, vector<1x128xf32>
      %165 = vector.broadcast %164 : vector<1x128xf32> to vector<32x128xf32>
      %166 = arith.addf %163, %165 : vector<32x128xf32>
      %167 = math.tanh %166 : vector<32x128xf32>
      %c0_76 = arith.constant 0 : index
      %c0_77 = arith.constant 0 : index
      %168 = vector.load %arg20[%c0_76, %c0_77] : memref<128x128xbf16, #tpu.memory_space<vmem>>, vector<128x128xbf16>
      %169 = arith.truncf %167 : vector<32x128xf32> to vector<32x128xbf16>
      %cst_78 = arith.constant dense<0.000000e+00> : vector<32x128xf32>
      %170 = tpu.matmul %169, %168, %cst_78 {dimension_numbers = #tpu.dot_dimension_numbers<[1], [0], [0], [1], [0, 0, 1, 1], [], []>} : vector<32x128xbf16>, vector<128x128xbf16>, vector<32x128xf32> -> vector<32x128xf32>
      %c0_79 = arith.constant 0 : index
      %c0_80 = arith.constant 0 : index
      %171 = vector.load %arg21[%c0_79, %c0_80] : memref<1x128xf32, #tpu.memory_space<vmem>>, vector<1x128xf32>
      %172 = vector.broadcast %171 : vector<1x128xf32> to vector<32x128xf32>
      %173 = arith.addf %170, %172 : vector<32x128xf32>
      %c0_81 = arith.constant 0 : index
      %c0_82 = arith.constant 0 : index
      %174 = vector.load %arg22[%c0_81, %c0_82] : memref<32x128xf32, #tpu.memory_space<vmem>>, vector<32x128xf32>
      tpu.vector_store %arg22[%c0_81, %c0_82], %173 {strides = array<i32>} : memref<32x128xf32, #tpu.memory_space<vmem>>, vector<32x128xf32>,
    } else {
    }
    return
  }
  func.func @transform_0(%arg0: i32) -> (i32, i32) {
    %c0_i32 = arith.constant 0 : i32
    %c0_i32_0 = arith.constant 0 : i32
    %c0_i32_1 = arith.constant 0 : i32
    return %c0_i32, %c0_i32_0 : i32, i32
  }
  func.func @transform_1(%arg0: i32) -> (i32, i32) {
    %c0_i32 = arith.constant 0 : i32
    %c0_i32_0 = arith.constant 0 : i32
    %c0_i32_1 = arith.constant 0 : i32
    return %c0_i32, %c0_i32_0 : i32, i32
  }
  func.func @transform_2(%arg0: i32) -> (i32, i32) {
    %c0_i32 = arith.constant 0 : i32
    %c0_i32_0 = arith.constant 0 : i32
    %c0_i32_1 = arith.constant 0 : i32
    return %c0_i32, %c0_i32_0 : i32, i32
  }
  func.func @transform_3(%arg0: i32) -> (i32, i32) {
    %c0_i32 = arith.constant 0 : i32
    %c0_i32_0 = arith.constant 0 : i32
    %c0_i32_1 = arith.constant 0 : i32
    return %c0_i32, %c0_i32_0 : i32, i32
  }
  func.func @transform_4(%arg0: i32) -> (i32, i32) {
    %c0_i32 = arith.constant 0 : i32
    %c0_i32_0 = arith.constant 0 : i32
    %c0_i32_1 = arith.constant 0 : i32
    return %c0_i32, %c0_i32_0 : i32, i32
  }
  func.func @transform_5(%arg0: i32) -> (i32, i32, i32) {
    %c0_i32 = arith.constant 0 : i32
    %c0_i32_0 = arith.constant 0 : i32
    %c0_i32_1 = arith.constant 0 : i32
    %c0_i32_2 = arith.constant 0 : i32
    return %c0_i32, %c0_i32_0, %c0_i32_1 : i32, i32, i32
  }
  func.func @transform_6(%arg0: i32) -> (i32, i32, i32) {
    %c0_i32 = arith.constant 0 : i32
    %c0_i32_0 = arith.constant 0 : i32
    %c0_i32_1 = arith.constant 0 : i32
    %c0_i32_2 = arith.constant 0 : i32
    return %c0_i32, %c0_i32_0, %c0_i32_1 : i32, i32, i32
  }
  func.func @transform_7(%arg0: i32) -> (i32, i32, i32) {
    %c0_i32 = arith.constant 0 : i32
    %c0_i32_0 = arith.constant 0 : i32
    %c0_i32_1 = arith.constant 0 : i32
    %c0_i32_2 = arith.constant 0 : i32
    return %c0_i32, %c0_i32_0, %c0_i32_1 : i32, i32, i32
  }
  func.func @transform_8(%arg0: i32) -> (i32, i32, i32) {
    %c0_i32 = arith.constant 0 : i32
    %c0_i32_0 = arith.constant 0 : i32
    %c0_i32_1 = arith.constant 0 : i32
    %c0_i32_2 = arith.constant 0 : i32
    return %c0_i32, %c0_i32_0, %c0_i32_1 : i32, i32, i32
  }
  func.func @transform_9(%arg0: i32) -> (i32, i32, i32) {
    %c0_i32 = arith.constant 0 : i32
    %c0_i32_0 = arith.constant 0 : i32
    %c0_i32_1 = arith.constant 0 : i32
    %c0_i32_2 = arith.constant 0 : i32
    return %c0_i32, %c0_i32_0, %c0_i32_1 : i32, i32, i32
  }
  func.func @transform_10(%arg0: i32) -> (i32, i32, i32) {
    %c0_i32 = arith.constant 0 : i32
    %c0_i32_0 = arith.constant 0 : i32
    %c0_i32_1 = arith.constant 0 : i32
    %c0_i32_2 = arith.constant 0 : i32
    return %c0_i32, %c0_i32_0, %c0_i32_1 : i32, i32, i32
  }
  func.func @transform_11(%arg0: i32) -> (i32, i32, i32) {
    %c0_i32 = arith.constant 0 : i32
    %c0_i32_0 = arith.constant 0 : i32
    %c0_i32_1 = arith.constant 0 : i32
    %c0_i32_2 = arith.constant 0 : i32
    return %c0_i32, %c0_i32_0, %c0_i32_1 : i32, i32, i32
  }
  func.func @transform_12(%arg0: i32) -> (i32, i32, i32) {
    %c0_i32 = arith.constant 0 : i32
    %c0_i32_0 = arith.constant 0 : i32
    %c0_i32_1 = arith.constant 0 : i32
    %c0_i32_2 = arith.constant 0 : i32
    return %c0_i32, %c0_i32_0, %c0_i32_1 : i32, i32, i32
  }
  func.func @transform_13(%arg0: i32) -> (i32, i32, i32) {
    %c0_i32 = arith.constant 0 : i32
    %c0_i32_0 = arith.constant 0 : i32
    %c0_i32_1 = arith.constant 0 : i32
    %c0_i32_2 = arith.constant 0 : i32
    return %c0_i32, %c0_i32_0, %c0_i32_1 : i32, i32, i32
  }
  func.func @transform_14(%arg0: i32) -> (i32, i32, i32) {
    %c0_i32 = arith.constant 0 : i32
    %c0_i32_0 = arith.constant 0 : i32
    %c0_i32_1 = arith.constant 0 : i32
    %c0_i32_2 = arith.constant 0 : i32
    return %c0_i32, %c0_i32_0, %c0_i32_1 : i32, i32, i32
  }
  func.func @transform_15(%arg0: i32) -> (i32, i32, i32) {
    %c0_i32 = arith.constant 0 : i32
    %c0_i32_0 = arith.constant 0 : i32
    %c0_i32_1 = arith.constant 0 : i32
    %c0_i32_2 = arith.constant 0 : i32
    return %c0_i32, %c0_i32_0, %c0_i32_1 : i32, i32, i32
  }
  func.func @transform_16(%arg0: i32) -> (i32, i32, i32) {
    %c0_i32 = arith.constant 0 : i32
    %c0_i32_0 = arith.constant 0 : i32
    %c0_i32_1 = arith.constant 0 : i32
    %c0_i32_2 = arith.constant 0 : i32
    return %c0_i32, %c0_i32_0, %c0_i32_1 : i32, i32, i32
  }
  func.func @transform_17(%arg0: i32) -> (i32, i32) {
    %c0_i32 = arith.constant 0 : i32
    %c0_i32_0 = arith.constant 0 : i32
    %c0_i32_1 = arith.constant 0 : i32
    return %c0_i32, %c0_i32_0 : i32, i32
  }
  func.func @transform_18(%arg0: i32) -> (i32, i32) {
    %c0_i32 = arith.constant 0 : i32
    %c0_i32_0 = arith.constant 0 : i32
    %c0_i32_1 = arith.constant 0 : i32
    return %c0_i32, %c0_i32_0 : i32, i32
  }
  func.func @transform_19(%arg0: i32) -> (i32, i32) {
    %c0_i32 = arith.constant 0 : i32
    %c0_i32_0 = arith.constant 0 : i32
    %c0_i32_1 = arith.constant 0 : i32
    return %c0_i32, %c0_i32_0 : i32, i32
  }
  func.func @transform_20(%arg0: i32) -> (i32, i32) {
    %c0_i32 = arith.constant 0 : i32
    %c0_i32_0 = arith.constant 0 : i32
    %c0_i32_1 = arith.constant 0 : i32
    return %c0_i32, %c0_i32_0 : i32, i32
  }
  func.func @transform_21(%arg0: i32) -> (i32, i32) {
    %c0_i32 = arith.constant 0 : i32
    %c0_i32_0 = arith.constant 0 : i32
    %c0_i32_1 = arith.constant 0 : i32
    return %c0_i32, %c0_i32_0 : i32, i32
  }
}

</mosaic_0001>

<bundles_post_ra>
// kernel: tile.9
= control target key start
LH: loop header
LB: loop body
LE: loop exit
PB: predicated region body
PF: predicated region fallthrough
CT: control target
= control target key end

     0   :  { %vm163_vm0 = vcmask 1047556   ;;  %s399_s10 = smov 96   ;;  %vm165_vm1 = vcmask 261120   ;;  %s401_s21 = smov 32   ;;  %vm202_vm2 = vcmask 1048320   ;;  %vm245_vm3 = vcmask 785920   ;;  %s580_s0 = inlined_call_operand.vmem [shape: f32[32,4,32], index: 0, kind: input, shape index: {}]   ;;  %s581_s1 = inlined_call_operand.vmem [shape: f32[32,128], index: 1, kind: output, shape index: {}]  }
   0x1   :  { %v377_v0 = vld [vmem:[%s580_s0 + $0x1c] sm:$0xf]  ;;  %v378_v1 = vld [vmem:[%s580_s0 + $0x18] sm:$0xf]  ;;  %v379_v2 = vld [vmem:[%s580_s0 + $0x14] sm:$0xf] }
   0x2   :  { %129 = vst [vmem:[#allocation0 + $0x38] sm:$0xf] %v377_v0  ;;  %134 = vst [vmem:[#allocation0 + $0x30] sm:$0xf] %v378_v1  ;;  %v380_v3 = vld [vmem:[%s580_s0 + $0x10] sm:$0xf] }
   0x3   :  { %139 = vst [vmem:[#allocation0 + $0x28] sm:$0xf] %v379_v2  ;;  %v381_v4 = vld [vmem:[%s580_s0 + $0xc] sm:$0xf]  ;;  %v382_v5 = vld [vmem:[%s580_s0 + $0x8] sm:$0xf] }
   0x4   :  { %144 = vst [vmem:[#allocation0 + $0x20] sm:$0xf] %v380_v3  ;;  %149 = vst [vmem:[#allocation0 + $0x18] sm:$0xf] %v381_v4  ;;  %v383_v6 = vld [vmem:[%s580_s0 + $0x4] sm:$0xf] }
   0x5   :  { %154 = vst [vmem:[#allocation0 + $0x10] sm:$0xf] %v382_v5  ;;  %v159_v7 = vld [vmem:[%s580_s0] sm:$0xf]  ;;  %158 = vst [vmem:[#allocation0 + $0x8] sm:$0xf] %v383_v6 }
   0x6   :  { %160 = vst [vmem:[#allocation0] sm:$0xf] %v159_v7  ;;  %v361_v8 = vld [vmem:[%s580_s0 + $0x5c] sm:$0xf]  ;;  %v362_v9 = vld [vmem:[%s580_s0 + $0x58] sm:$0xf] }
   0x7   :  { %v363_v10 = vld [vmem:[%s580_s0 + $0x54] sm:$0xf]  ;;  %49 = vst [vmem:[#allocation0 + $0xb8] sm:$0xf] %v361_v8  ;;  %54 = vst [vmem:[#allocation0 + $0xb0] sm:$0xf] %v362_v9 }
   0x8   :  { %59 = vst [vmem:[#allocation0 + $0xa8] sm:$0xf] %v363_v10  ;;  %v364_v11 = vld [vmem:[%s580_s0 + $0x50] sm:$0xf]  ;;  %v365_v12 = vld [vmem:[%s580_s0 + $0x4c] sm:$0xf] }
   0x9   :  { %v366_v13 = vld [vmem:[%s580_s0 + $0x48] sm:$0xf]  ;;  %64 = vst [vmem:[#allocation0 + $0xa0] sm:$0xf] %v364_v11  ;;  %69 = vst [vmem:[#allocation0 + $0x98] sm:$0xf] %v365_v12 }
   0xa   :  { %74 = vst [vmem:[#allocation0 + $0x90] sm:$0xf] %v366_v13  ;;  %v367_v14 = vld [vmem:[%s580_s0 + $0x44] sm:$0xf]  ;;  %v368_v15 = vld [vmem:[%s580_s0 + $0x40] sm:$0xf] }
   0xb   :  { %v369_v16 = vld [vmem:[%s580_s0 + $0x3c] sm:$0xf]  ;;  %79 = vst [vmem:[#allocation0 + $0x88] sm:$0xf] %v367_v14  ;;  %84 = vst [vmem:[#allocation0 + $0x80] sm:$0xf] %v368_v15 }
   0xc   :  { %89 = vst [vmem:[#allocation0 + $0x78] sm:$0xf] %v369_v16  ;;  %v370_v17 = vld [vmem:[%s580_s0 + $0x38] sm:$0xf]  ;;  %v371_v18 = vld [vmem:[%s580_s0 + $0x34] sm:$0xf] }
   0xd   :  { %v372_v19 = vld [vmem:[%s580_s0 + $0x30] sm:$0xf]  ;;  %94 = vst [vmem:[#allocation0 + $0x70] sm:$0xf] %v370_v17  ;;  %99 = vst [vmem:[#allocation0 + $0x68] sm:$0xf] %v371_v18 }
   0xe   :  { %104 = vst [vmem:[#allocation0 + $0x60] sm:$0xf] %v372_v19  ;;  %v373_v20 = vld [vmem:[%s580_s0 + $0x2c] sm:$0xf]  ;;  %v374_v21 = vld [vmem:[%s580_s0 + $0x28] sm:$0xf] }
   0xf   :  { %v375_v22 = vld [vmem:[%s580_s0 + $0x24] sm:$0xf]  ;;  %109 = vst [vmem:[#allocation0 + $0x58] sm:$0xf] %v373_v20  ;;  %114 = vst [vmem:[#allocation0 + $0x50] sm:$0xf] %v374_v21 }
  0x10   :  { %119 = vst [vmem:[#allocation0 + $0x48] sm:$0xf] %v375_v22  ;;  %v376_v23 = vld [vmem:[%s580_s0 + $0x20] sm:$0xf]  ;;  %v353_v24 = vld [vmem:[%s580_s0 + $0x7c] sm:$0xf] }
  0x11   :  { %v354_v25 = vld [vmem:[%s580_s0 + $0x78] sm:$0xf]  ;;  %124 = vst [vmem:[#allocation0 + $0x40] sm:$0xf] %v376_v23  ;;  %9 = vst [vmem:[#allocation0 + $0xf8] sm:$0xf] %v353_v24 }
  0x12   :  { %v197_v26 = vld [vmem:[#allocation0 + $0x3] ss:$8 sm:$0xf0]   ;;  %14 = vst [vmem:[#allocation0 + $0xf0] sm:$0xf] %v354_v25  ;;  %vm288_vm4 = vcmask 523520  }
  0x13   :  { %v355_v27 = vld [vmem:[%s580_s0 + $0x74] sm:$0xf]  ;;  %v195_v28 = vld [vmem:[#allocation0 + $0x3] ss:$8 sm:$0xf]  }
  0x14   :  { %19 = vst [vmem:[#allocation0 + $0xe8] sm:$0xf] %v355_v27  ;;  %v356_v29 = vld [vmem:[%s580_s0 + $0x70] sm:$0xf]  ;;  %v199_v30 = vsel %vm163_vm0, %v197_v26, %v195_v28  ;;  %v357_v31 = vld [vmem:[%s580_s0 + $0x6c] sm:$0xf] }
  0x15   :  { %24 = vst [vmem:[#allocation0 + $0xe0] sm:$0xf] %v356_v29  ;;  %v358_v32 = vld [vmem:[%s580_s0 + $0x68] sm:$0xf]  ;;  %v359_v33 = vld [vmem:[%s580_s0 + $0x64] sm:$0xf]  ;;  %200 = vrot.lane.b32.xlu0 %v199_v30, %s399_s10 }
  0x16   :  { %v218_v34 = vld [vmem:[#allocation0 + $0x83] ss:$8 sm:$0xf0]   ;;  %29 = vst [vmem:[#allocation0 + $0xd8] sm:$0xf] %v357_v31 }
  0x17   :  { %34 = vst [vmem:[#allocation0 + $0xd0] sm:$0xf] %v358_v32  ;;  %39 = vst [vmem:[#allocation0 + $0xc8] sm:$0xf] %v359_v33  ;;  %v360_v35 = vld [vmem:[%s580_s0 + $0x60] sm:$0xf] }
  0x18   :  { %v216_v36 = vld [vmem:[#allocation0 + $0x83] ss:$8 sm:$0xf]   ;;  %44 = vst [vmem:[#allocation0 + $0xc0] sm:$0xf] %v360_v35  ;;  %s400_s0 = smov 64  }
  0x19   :  { %v220_v37 = vsel %vm163_vm0, %v218_v34, %v216_v36  ;;  %v207_v38 = vld [vmem:[#allocation0 + $0x43] ss:$8 sm:$0xf0]   ;;  %v238_v39 = vld [vmem:[#allocation0 + $0x2] ss:$8 sm:$0xf]  }
  0x1a   :  { %221 = vrot.lane.b32.xlu1 %v220_v37, %s399_s10  ;;  %v205_v40 = vld [vmem:[#allocation0 + $0x43] ss:$8 sm:$0xf]   ;;  %v240_v41 = vld [vmem:[#allocation0 + $0x2] ss:$8 sm:$0xf0]  }
  0x1b   :  { %v209_v42 = vsel %vm163_vm0, %v207_v38, %v205_v40  ;;  %v250_v44 = vld [vmem:[#allocation0 + $0x42] ss:$8 sm:$0xf0]   ;;  %v242_v45 = vsel %vm163_vm0, %v240_v41, %v238_v39  ;;  %v281_v52 = vld [vmem:[#allocation0 + $0x1] ss:$8 sm:$0xf]  }
  0x1c   :  { %210 = vrot.lane.b32.xlu0 %v209_v42, %s399_s10  ;;  %v229_v43 = vld [vmem:[#allocation0 + $0xc3] ss:$8 sm:$0xf0]   ;;  %v248_v46 = vld [vmem:[#allocation0 + $0x42] ss:$8 sm:$0xf]  }
  0x1d   :  { %v259_v47 = vld [vmem:[#allocation0 + $0x82] ss:$8 sm:$0xf]   ;;  %v252_v53 = vsel %vm163_vm0, %v250_v44, %v248_v46  ;;  %v283_v55 = vld [vmem:[#allocation0 + $0x1] ss:$8 sm:$0xf0]  }
  0x1e   :  { %v261_v49 = vld [vmem:[#allocation0 + $0x82] ss:$8 sm:$0xf0]   ;;  %v161_v56 = vld [vmem:[#allocation0] ss:$8 sm:$0xf]   ;;  %v285_v4 = vsel %vm163_vm0, %v283_v55, %v281_v52 }
  0x1f   :  { %v227_v48 = vld [vmem:[#allocation0 + $0xc3] ss:$8 sm:$0xf]   ;;  %v272_v51 = vld [vmem:[#allocation0 + $0xc2] ss:$8 sm:$0xf0]   ;;  %v263_v54 = vsel %vm163_vm0, %v261_v49, %v259_v47 }
  0x20   :  { %v231_v50 = vsel %vm163_vm0, %v229_v43, %v227_v48  ;;  %243 = vrot.lane.b32.xlu0 %v242_v45, %s400_s0  ;;  %v270_v57 = vld [vmem:[#allocation0 + $0xc2] ss:$8 sm:$0xf]   ;;  %v162_v58 = vld [vmem:[#allocation0] ss:$8 sm:$0xf0]  }
  0x21   :  { %232 = vrot.lane.b32.xlu1 %v231_v50, %s399_s10  ;;  %v164_v59 = vsel %vm163_vm0, %v162_v58, %v161_v56  ;;  %v177_v60 = vld [vmem:[#allocation0 + $0x80] ss:$8 sm:$0xf]   ;;  %v291_v62 = vld [vmem:[#allocation0 + $0x41] ss:$8 sm:$0xf]   ;;  %v274_v3 = vsel %vm163_vm0, %v272_v51, %v270_v57 }
  0x22   :  { %v179_v61 = vld [vmem:[#allocation0 + $0x80] ss:$8 sm:$0xf0]   ;;  %v293_v63 = vld [vmem:[#allocation0 + $0x41] ss:$8 sm:$0xf0]  }
  0x23   :  { %166 = vst.msk [vmem:[%s581_s1] sm:$0xff] %vm165_vm1, %v164_v59   ;;  %v181_v0 = vsel %vm163_vm0, %v179_v61, %v177_v60  ;;  %v168_v1 = vld [vmem:[#allocation0 + $0x40] ss:$8 sm:$0xf]   ;;  %v295_v11 = vsel %vm163_vm0, %v293_v63, %v291_v62 }
  0x24   :  { %264 = vrot.lane.b32.xlu0 %v263_v54, %s400_s0  ;;  %v170_v2 = vld [vmem:[#allocation0 + $0x40] ss:$8 sm:$0xf0]   ;;  %385 = vst.msk [vmem:[%s581_s1 + $0x10] sm:$0xff] %vm165_vm1, %v181_v0  }
  0x25   :  { %253 = vrot.lane.b32.xlu1 %v252_v53, %s400_s0  ;;  %v172_v5 = vsel %vm163_vm0, %v170_v2, %v168_v1  ;;  %v186_v6 = vld [vmem:[#allocation0 + $0xc0] ss:$8 sm:$0xf]   ;;  %v302_v8 = vld [vmem:[#allocation0 + $0x81] ss:$8 sm:$0xf]  }
  0x26   :  { %v188_v7 = vld [vmem:[#allocation0 + $0xc0] ss:$8 sm:$0xf0]   ;;  %v304_v9 = vld [vmem:[#allocation0 + $0x81] ss:$8 sm:$0xf0]  }
  0x27   :  { %384 = vst.msk [vmem:[%s581_s1 + $0x8] sm:$0xff] %vm165_vm1, %v172_v5   ;;  %v190_v10 = vsel %vm163_vm0, %v188_v7, %v186_v6  ;;  %v306_v12 = vsel %vm163_vm0, %v304_v9, %v302_v8  ;;  %v313_v13 = vld [vmem:[#allocation0 + $0xc1] ss:$8 sm:$0xf]  }
  0x28   :  { %386 = vst.msk [vmem:[%s581_s1 + $0x18] sm:$0xff] %vm165_vm1, %v190_v10   ;;  %286 = vrot.lane.b32.xlu0 %v285_v4, %s401_s21  ;;  %v315_v14 = vld [vmem:[#allocation0 + $0xc1] ss:$8 sm:$0xf0]  }
  0x29   :  { %275 = vrot.lane.b32.xlu1 %v274_v3, %s400_s0  ;;  %v317_v15 = vsel %vm163_vm0, %v315_v14, %v313_v13 }
  0x2c   :  { %307 = vrot.lane.b32.xlu0 %v306_v12, %s401_s21 }
  0x2d   :  { %296 = vrot.lane.b32.xlu1 %v295_v11, %s401_s21 }
  0x31   :  { %318 = vrot.lane.b32.xlu1 %v317_v15, %s401_s21 }
  0x87   :  { %v201_v16 = vpop.permute.xlu0 %200  }
  0x88   :  { %203 = vst.msk [vmem:[%s581_s1] sm:$0xff] %vm202_vm2, %v201_v16  }
  0x8c   :  { %v222_v17 = vpop.permute.xlu1 %221  }
  0x8d   :  { %388 = vst.msk [vmem:[%s581_s1 + $0x10] sm:$0xff] %vm202_vm2, %v222_v17  }
  0x8e   :  { %v211_v18 = vpop.permute.xlu0 %210  }
  0x8f   :  { %387 = vst.msk [vmem:[%s581_s1 + $0x8] sm:$0xff] %vm202_vm2, %v211_v18  }
  0x92   :  { %v244_v20 = vpop.permute.xlu0 %243  }
  0x93   :  { %v233_v19 = vpop.permute.xlu1 %232   ;;  %246 = vst.msk [vmem:[%s581_s1] sm:$0xff] %vm245_vm3, %v244_v20  }
  0x94   :  { %389 = vst.msk [vmem:[%s581_s1 + $0x18] sm:$0xff] %vm202_vm2, %v233_v19  }
  0x96   :  { %v265_v22 = vpop.permute.xlu0 %264  }
  0x97   :  { %v254_v21 = vpop.permute.xlu1 %253   ;;  %391 = vst.msk [vmem:[%s581_s1 + $0x10] sm:$0xff] %vm245_vm3, %v265_v22  }
  0x98   :  { %390 = vst.msk [vmem:[%s581_s1 + $0x8] sm:$0xff] %vm245_vm3, %v254_v21  }
  0x9a   :  { %v287_v24 = vpop.permute.xlu0 %286  }
  0x9b   :  { %v276_v23 = vpop.permute.xlu1 %275   ;;  %289 = vst.msk [vmem:[%s581_s1] sm:$0xff] %vm288_vm4, %v287_v24  }
  0x9c   :  { %392 = vst.msk [vmem:[%s581_s1 + $0x18] sm:$0xff] %vm245_vm3, %v276_v23  }
  0x9e   :  { %v308_v26 = vpop.permute.xlu0 %307  }
  0x9f   :  { %v297_v25 = vpop.permute.xlu1 %296   ;;  %394 = vst.msk [vmem:[%s581_s1 + $0x10] sm:$0xff] %vm288_vm4, %v308_v26  }
  0xa0   :  { %393 = vst.msk [vmem:[%s581_s1 + $0x8] sm:$0xff] %vm288_vm4, %v297_v25  }
  0xa3   :  { %v319_v27 = vpop.permute.xlu1 %318  }
  0xa4   :  { %395 = vst.msk [vmem:[%s581_s1 + $0x18] sm:$0xff] %vm288_vm4, %v319_v27  }

// kernel: roberta_pair_forward.1
= control target key start
LH: loop header
LB: loop body
LE: loop exit
PB: predicated region body
PF: predicated region fallthrough
CT: control target
= control target key end

     0   :  { %s4181_s0 = inlined_call_operand.vmem [shape: f32[32,128], index: 0, kind: input, shape index: {}]   ;;  %s4182_s1 = inlined_call_operand.vmem [shape: f32[32,128], index: 1, kind: input, shape index: {}]   ;;  %s4183_s2 = inlined_call_operand.vmem [shape: f32[128,128], index: 2, kind: input, shape index: {}]   ;;  %s4184_s3 = inlined_call_operand.hbm [shape: f32[1,128], index: 3, kind: input, shape index: {}]   ;;  %s4185_s4 = inlined_call_operand.hbm [shape: f32[1,128], index: 4, kind: input, shape index: {}]   ;;  %s4186_s5 = inlined_call_operand.vmem [shape: bf16[2,128,384], index: 5, kind: input, shape index: {}]   ;;  %s4187_s6 = inlined_call_operand.vmem [shape: f32[2,1,384], index: 6, kind: input, shape index: {}]   ;;  %s4188_s7 = inlined_call_operand.vmem [shape: bf16[2,128,128], index: 7, kind: input, shape index: {}]   ;;  %s4189_s8 = inlined_call_operand.hbm [shape: f32[2,1,128], index: 8, kind: input, shape index: {}]   ;;  %s4190_s9 = inlined_call_operand.vmem [shape: f32[2,1,128], index: 9, kind: input, shape index: {}]   ;;  %s4191_s10 = inlined_call_operand.vmem [shape: f32[2,1,128], index: 10, kind: input, shape index: {}]   ;;  %s4192_s11 = inlined_call_operand.vmem [shape: bf16[2,128,256], index: 11, kind: input, shape index: {}]   ;;  %s4193_s12 = inlined_call_operand.hbm [shape: f32[2,1,256], index: 12, kind: input, shape index: {}]   ;;  %s4194_s13 = inlined_call_operand.vmem [shape: bf16[2,256,128], index: 13, kind: input, shape index: {}]   ;;  %s4195_s14 = inlined_call_operand.hbm [shape: f32[2,1,128], index: 14, kind: input, shape index: {}]   ;;  %s4196_s15 = inlined_call_operand.vmem [shape: f32[2,1,128], index: 15, kind: input, shape index: {}]   ;;  %s4197_s16 = inlined_call_operand.vmem [shape: f32[2,1,128], index: 16, kind: input, shape index: {}]   ;;  %s4198_s17 = inlined_call_operand.vmem [shape: bf16[128,128], index: 17, kind: input, shape index: {}]   ;;  %s4199_s18 = inlined_call_operand.hbm [shape: f32[1,128], index: 18, kind: input, shape index: {}]   ;;  %s4200_s19 = inlined_call_operand.vmem [shape: bf16[128,128], index: 19, kind: input, shape index: {}]   ;;  %s4201_s20 = inlined_call_operand.vmem [shape: f32[1,128], index: 20, kind: input, shape index: {}]   ;;  %s4202_s21 = inlined_call_operand.vmem [shape: f32[32,128], index: 21, kind: output, shape index: {}]  }
   0x1   :  { %4208 = sst [smem:[#allocation19_spill]] %s4181_s0 }
   0x2   :  { %4209 = sst [smem:[#allocation20_spill]] %s4182_s1 }
   0x3   :  { %4210 = sst [smem:[#allocation21_spill]] %s4183_s2 }
   0x4   :  { %4211 = sst [smem:[#allocation22_spill]] %s4184_s3 }
   0x5   :  { %4212 = sst [smem:[#allocation23_spill]] %s4185_s4 }
   0x6   :  { %4213 = sst [smem:[#allocation24_spill]] %s4186_s5 }
   0x7   :  { %4214 = sst [smem:[#allocation25_spill]] %s4201_s20 }
   0x8   :  { %4215 = sst [smem:[#allocation26_spill]] %s4202_s21 }
   0x9   :  { %26 = vsyncpa [#allocation6], 0 }
   0xa   :  { %27 = vsyncpa [#allocation8], 0 }
   0xb   :  { %28 = vsyncpa [#allocation11], 0 }
   0xc   :  { %29 = vsyncpa [#allocation14], 0  ;;  %s3614_s2 = smov 0  }
   0xd LB: > { %s3492_s25 = smov [#allocation7]   ;;  %s3620_s27 = sadd.s32 4294967295, %s3490_s2   ;;  %s3490_s2 = sphi %s3614_s2, %s35_s2  }
   0xe   : > { %s535_s26 = sshll.u32 %s3492_s25, 4  ;;  %p2618_p0 = scmp.ge.s32.totalorder %s3490_s2, 1  ;;  %s536_s26 = int_to_ptr.vmem [resolvable:$true] %s535_s26 }
   0xf   : > { %p502_p1 = scmp.lt.s32.totalorder %s3490_s2, 3  ;;  %p4207_p3 = scmp.eq.s32.totalorder %s3620_s27, 0 }
  0x10   : > { %s3493_s28 = smov [#allocation10]   ;;  %s3494_s4 = smov [#allocation5]  }
  0x11   : > { %p3626_p4 = pnand %p2618_p0, %p502_p1  ;;  %s576_s29 = sshll.u32 %s3493_s28, 4  ;;  %s3632_s29 = int_to_ptr.vmem [resolvable:$true] %s576_s29 }
  0x12   : > { %s524_s30 = sshll.u32 %s3494_s4, 4  ;;  %s3495_s5 = smov [#allocation9]   ;;  %s3640_s30 = int_to_ptr.vmem [resolvable:$true] %s524_s30 }
  0x13   : > { %p3085_p5 = pneg %p3626_p4  ;;  %s3642_s22 = sshll.u32 %s3495_s5, 4  ;;  %s555_s22 = int_to_ptr.vmem [resolvable:$true] %s3642_s22 }
  0x14   : > { %s3323_s1 = scalar_lea.vmem %s536_s26, 16  ;;  %s3330_s24 = scalar_lea.vmem %s536_s26, 32 }
  0x15   : > { %p3636_p6 = pnand %p4207_p3, %p3085_p5  ;;  %p3324_p8 = scmp.ne.s32.totalorder %s536_s26, %s3323_s1 }
  0x16   : > { %p3331_p11 = scmp.lt.s32.totalorder %s536_s26, %s536_s26  ;;  %p3332_p12 = scmp.lt.s32.totalorder %s3330_s24, %s3323_s1 }
  0x17   : > { %p3646_p7 = pneg %p3636_p6 }
  0x18   : > { %p3333_p13 = por %p3332_p12, %p3331_p11 }
  0x19   : > { %p3326_p9 = pnand %p3324_p8, %p3646_p7 }
  0x1b   : > { %p3327_p10 = pneg %p3326_p9 }
  0x1d   : > { %p3334_p0 = pnand %p3333_p13, %p3327_p10 }
  0x1f   : > { %3337 = shalt.err (!%p3334_p0)
}
  0x20   : > { %s4219_s4 = sld [smem:[#allocation23_spill]]  ;;  %s3349_s5 = scalar_lea.vmem %s3632_s29, 64 }
  0x21   : > { %p3350_p1 = scmp.ne.s32.totalorder %s3632_s29, %s3349_s5  ;;  %p3357_p9 = scmp.lt.s32.totalorder %s3632_s29, %s3632_s29 }
  0x22   : > { %p3358_p11 = scmp.lt.s32.totalorder %s3349_s5, %s3349_s5 }
  0x23   : > { %p3352_p5 = pnand %p3350_p1, %p3646_p7 }
  0x24   : > { %p3359_p10 = por %p3358_p11, %p3357_p9 }
  0x25   : > { %p3353_p8 = pneg %p3352_p5 }
  0x26   : > { %3091 = dma.hbm_to_vmem [thread:$0]  (!%p3636_p6), %s4219_s4, 16, %s536_s26, [#allocation8]  }
  0x27   : > { %p3360_p12 = pnand %p3359_p10, %p3353_p8 }
  0x29   : > { %3363 = shalt.err (!%p3360_p12)
}
  0x2a   : > { %s3496_s1 = smov 32   ;;  %s3497_s26 = smov 2  }
  0x2b   : > { %3097 = dma.hbm_to_vmem [thread:$0]  (!%p3636_p6), %s4193_s12, 64, %s3632_s29, [#allocation11], %s3496_s1, %s3496_s1, %s3497_s26  }
  0x2c   : > { %s3375_s28 = scalar_lea.vmem %s3640_s30, 16  ;;  %s3382_s4 = scalar_lea.vmem %s3640_s30, 32 }
  0x2d   : > { %p3376_p13 = scmp.ne.s32.totalorder %s3640_s30, %s3375_s28  ;;  %p3383_p5 = scmp.lt.s32.totalorder %s3640_s30, %s3640_s30 }
  0x2e   : > { %p3384_p8 = scmp.lt.s32.totalorder %s3382_s4, %s3375_s28 }
  0x2f   : > { %p3378_p0 = pnand %p3376_p13, %p3646_p7 }
  0x30   : > { %p3385_p9 = por %p3384_p8, %p3383_p5 }
  0x31   : > { %p3379_p1 = pneg %p3378_p0 }
  0x33   : > { %p3386_p11 = pnand %p3385_p9, %p3379_p1 }
  0x35   : > { %3389 = shalt.err (!%p3386_p11)
}
  0x36   : > { %s4220_s20 = sld [smem:[#allocation22_spill]]  ;;  %s3401_s29 = scalar_lea.vmem %s555_s22, 32 }
  0x37   : > { %p3402_p10 = scmp.ne.s32.totalorder %s555_s22, %s3401_s29  ;;  %p3409_p0 = scmp.lt.s32.totalorder %s555_s22, %s555_s22 }
  0x38   : > { %p3410_p2 = scmp.lt.s32.totalorder %s3401_s29, %s3401_s29 }
  0x39   : > { %p3404_p12 = pnand %p3402_p10, %p3646_p7 }
  0x3a   : > { %p3411_p5 = por %p3410_p2, %p3409_p0 }
  0x3b   : > { %p3405_p13 = pneg %p3404_p12 }
  0x3c   : > { %3088 = dma.hbm_to_vmem [thread:$0]  (!%p3636_p6), %s4220_s20, 16, %s3640_s30, [#allocation6]  }
  0x3d   : > { %p3412_p1 = pnand %p3411_p5, %p3405_p13 }
  0x3f   : > { %3415 = shalt.err (!%p3412_p1)
}
  0x40   : > { %s3498_s1 = smov 16   ;;  %s3499_s26 = smov 1  }
  0x41   : > { %3094 = dma.hbm_to_vmem [thread:$0]  (!%p3636_p6), %s4189_s8, 32, %s555_s22, [#allocation8], %s3498_s1, %s3498_s1, %s3499_s26  }
  0x42   : > { %s3500_s20 = smov [#allocation12]   ;;  %s3501_s25 = smov [#allocation13]  }
  0x43   : > { %s592_s30 = sshll.u32 %s3500_s20, 4  ;;  %s615_s28 = sshll.u32 %s3501_s25, 4  ;;  %s593_s30 = int_to_ptr.vmem [resolvable:$true] %s592_s30  ;;  %s616_s28 = int_to_ptr.vmem [resolvable:$true] %s615_s28 }
  0x44   : > { %s3427_s4 = scalar_lea.vmem %s593_s30, 32  ;;  %p3435_p11 = scmp.lt.s32.totalorder %s593_s30, %s593_s30 }
  0x45   : > { %p3428_p8 = scmp.ne.s32.totalorder %s593_s30, %s3427_s4  ;;  %p3436_p10 = scmp.lt.s32.totalorder %s3427_s4, %s3427_s4 }
  0x47   : > { %p3430_p2 = pnand %p3428_p8, %p3646_p7  ;;  %p3437_p12 = por %p3436_p10, %p3435_p11 }
  0x49   : > { %p3431_p9 = pneg %p3430_p2 }
  0x4b   : > { %p3438_p13 = pnand %p3437_p12, %p3431_p9 }
  0x4d   : > { %3441 = shalt.err (!%p3438_p13)
}
  0x4e   : > { %3100 = dma.hbm_to_vmem [thread:$0]  (!%p3636_p6), %s4195_s14, 32, %s593_s30, [#allocation11], %s3498_s1, %s3498_s1, %s3499_s26  }
  0x4f   : > { %s3453_s22 = scalar_lea.vmem %s616_s28, 16  ;;  %s3460_s21 = scalar_lea.vmem %s616_s28, 32 }
  0x50   : > { %p3454_p0 = scmp.ne.s32.totalorder %s616_s28, %s3453_s22  ;;  %p3461_p8 = scmp.lt.s32.totalorder %s616_s28, %s616_s28 }
  0x51   : > { %p3462_p2 = scmp.lt.s32.totalorder %s3460_s21, %s3453_s22 }
  0x52   : > { %p3456_p5 = pnand %p3454_p0, %p3646_p7 }
  0x53   : > { %p3463_p3 = por %p3462_p2, %p3461_p8 }
  0x54   : > { %p3457_p1 = pneg %p3456_p5 }
  0x56   : > { %p3464_p11 = pnand %p3463_p3, %p3457_p1 }
  0x58   : > { %3467 = shalt.err (!%p3464_p11)
}
  0x59   : > { %3103 = dma.hbm_to_vmem [thread:$0]  (!%p3636_p6), %s4199_s18, 16, %s616_s28, [#allocation14]  }
  0x5a   : > { %634 = sbr.rel (%p3626_p4) target bundleno = 2836 (0xb14), region = 104  ;;  %p4221_p9 = scmp.eq.s32.totalorder (!%p3626_p4), %s3620_s27, 0 }
  0x5f   : > { %3473 = dma.done.wait (%p4221_p9), [#allocation6], 16   ;;  %p4222_p7 = pmov %p4221_p9 }
  0x61   : > { %3475 = vsyncadd (%p4222_p7), [#allocation6], 4294967280  ;;  %p4223_p10 = pmov %p4222_p7 }
  0x62   : > { %p4224_p3 = pmov %p4222_p7 }
  0x63   : > { %3477 = dma.done.wait (%p4223_p10), [#allocation8], 48  }
  0x64   : > { %3479 = vsyncadd (%p4224_p3), [#allocation8], 4294967248  ;;  %p4225_p12 = pmov %p4224_p3 }
  0x65   : > { %p4226_p6 = pmov %p4224_p3 }
  0x66   : > { %3481 = dma.done.wait (%p4225_p12), [#allocation11], 96  }
  0x67   : > { %3483 = vsyncadd (%p4226_p6), [#allocation11], 4294967200  ;;  %p4227_p4 = pmov %p4224_p3 }
  0x68   : > { %p4228_p13 = pmov %p4224_p3 }
  0x69   : > { %3485 = dma.done.wait (%p4227_p4), [#allocation14], 16  }
  0x6a   : > { %3487 = vsyncadd (%p4228_p13), [#allocation14], 4294967280  ;;  %p4229_p0 = scmp.ne.s32.totalorder %s3620_s27, 0 }
  0x6b   : > { %s4230_s23 = sld [smem:[#allocation19_spill]] (!%p4229_p0) }
  0x6c   : > { %708 = sbr.rel (%p4229_p0) target bundleno = 292 (0x124), region = 132 }
  0x71   : > { %v3727_v0 = vld [vmem:[%s4230_s23 + $0x10] sm:$0xff]  ;;  %v3732_v1 = vld [vmem:[%s4230_s23] sm:$0xff]  ;;  %v3739_v2 = vld [vmem:[%s4230_s23 + $0x18] sm:$0xff]  ;;  %v3502_v8 = vmov 0  }
  0x72   : > { %719 = vadd.xlane.f32.xlu1 %v3727_v0  ;;  %715 = vadd.xlane.f32.xlu0 %v3732_v1  ;;  %v3744_v3 = vld [vmem:[%s4230_s23 + $0x8] sm:$0xff]  ;;  %v728_v5 = vmul.f32 %v3732_v1, %v3732_v1  ;;  %v731_v6 = vmul.f32 %v3739_v2, %v3739_v2  ;;  %v730_v7 = vmul.f32 %v3727_v0, %v3727_v0  ;;  %v2633_v40 = vld [vmem:[#allocation5] ss:$0 sm:$0xff]  ;;  %v2634_v43 = vld [vmem:[#allocation7] ss:$0 sm:$0xff] }
  0x73   : > { %v729_v4 = vmul.f32 %v3744_v3, %v3744_v3  ;;  %792 = vst [vmem:[#allocation3] sm:$0xf] %v3502_v8  ;;  %793 = vst [vmem:[#allocation3 + $0x4] sm:$0xf] %v3502_v8 }
  0x74   : > { %794 = vst [vmem:[#allocation3 + $0x8] sm:$0xf] %v3502_v8  ;;  %795 = vst [vmem:[#allocation3 + $0xc] sm:$0xf] %v3502_v8 }
  0x75   : > { %796 = vst [vmem:[#allocation3 + $0x10] sm:$0xf] %v3502_v8  ;;  %797 = vst [vmem:[#allocation3 + $0x14] sm:$0xf] %v3502_v8 }
  0x76   : > { %721 = vadd.xlane.f32.xlu1 %v3739_v2  ;;  %717 = vadd.xlane.f32.xlu0 %v3744_v3  ;;  %798 = vst [vmem:[#allocation3 + $0x18] sm:$0xf] %v3502_v8  ;;  %799 = vst [vmem:[#allocation3 + $0x1c] sm:$0xf] %v3502_v8 }
  0x77   : > { %800 = vst [vmem:[#allocation3 + $0x20] sm:$0xf] %v3502_v8  ;;  %801 = vst [vmem:[#allocation3 + $0x24] sm:$0xf] %v3502_v8 }
  0x78   : > { %802 = vst [vmem:[#allocation3 + $0x28] sm:$0xf] %v3502_v8  ;;  %803 = vst [vmem:[#allocation3 + $0x2c] sm:$0xf] %v3502_v8 }
  0x79   : > { %804 = vst [vmem:[#allocation3 + $0x30] sm:$0xf] %v3502_v8  ;;  %805 = vst [vmem:[#allocation3 + $0x34] sm:$0xf] %v3502_v8 }
  0x7a   : > { %734 = vadd.xlane.f32.xlu1 %v729_v4  ;;  %732 = vadd.xlane.f32.xlu0 %v728_v5  ;;  %806 = vst [vmem:[#allocation3 + $0x38] sm:$0xf] %v3502_v8  ;;  %807 = vst [vmem:[#allocation3 + $0x3c] sm:$0xf] %v3502_v8 }
  0x7b   : > { %808 = vst [vmem:[#allocation4] sm:$0xf] %v3502_v8  ;;  %809 = vst [vmem:[#allocation4 + $0x4] sm:$0xf] %v3502_v8 }
  0x7c   : > { %810 = vst [vmem:[#allocation4 + $0x8] sm:$0xf] %v3502_v8  ;;  %811 = vst [vmem:[#allocation4 + $0xc] sm:$0xf] %v3502_v8 }
  0x7d   : > { %812 = vst [vmem:[#allocation4 + $0x10] sm:$0xf] %v3502_v8  ;;  %813 = vst [vmem:[#allocation4 + $0x14] sm:$0xf] %v3502_v8 }
  0x7e   : > { %738 = vadd.xlane.f32.xlu1 %v731_v6  ;;  %736 = vadd.xlane.f32.xlu0 %v730_v7  ;;  %814 = vst [vmem:[#allocation4 + $0x18] sm:$0xf] %v3502_v8  ;;  %815 = vst [vmem:[#allocation4 + $0x1c] sm:$0xf] %v3502_v8 }
  0x7f   : > { %816 = vst [vmem:[#allocation4 + $0x20] sm:$0xf] %v3502_v8  ;;  %817 = vst [vmem:[#allocation4 + $0x24] sm:$0xf] %v3502_v8 }
  0x80   : > { %818 = vst [vmem:[#allocation4 + $0x28] sm:$0xf] %v3502_v8  ;;  %819 = vst [vmem:[#allocation4 + $0x2c] sm:$0xf] %v3502_v8 }
  0x81   : > { %820 = vst [vmem:[#allocation4 + $0x30] sm:$0xf] %v3502_v8  ;;  %821 = vst [vmem:[#allocation4 + $0x34] sm:$0xf] %v3502_v8 }
  0x82   : > { %822 = vst [vmem:[#allocation4 + $0x38] sm:$0xf] %v3502_v8  ;;  %823 = vst [vmem:[#allocation4 + $0x3c] sm:$0xf] %v3502_v8 }
  0xfb   : > { %v720_v9 = vpop.xlane.xlu1 %719  ;;  %v716_v10 = vpop.xlane.xlu0 %715 }
  0xfc   : > { %v724_v13 = vmul.f32 0.0078125, %v716_v10  ;;  %v726_v15 = vmul.f32 0.0078125, %v720_v9 }
  0xfe   : > { %v744_v19 = vmul.f32 %v724_v13, %v724_v13  ;;  %v746_v25 = vmul.f32 %v726_v15, %v726_v15  ;;  %v752_v39 = vsub.f32 %v3732_v1, %v724_v13  ;;  %v754_v48 = vsub.f32 %v3727_v0, %v726_v15 }
  0xff   : > { %v722_v11 = vpop.xlane.xlu1 %721  ;;  %v718_v12 = vpop.xlane.xlu0 %717 }
 0x100   : > { %v725_v14 = vmul.f32 0.0078125, %v718_v12  ;;  %v727_v16 = vmul.f32 0.0078125, %v722_v11 }
 0x102   : > { %v745_v20 = vmul.f32 %v725_v14, %v725_v14  ;;  %v747_v26 = vmul.f32 %v727_v16, %v727_v16  ;;  %v753_v37 = vsub.f32 %v3744_v3, %v725_v14  ;;  %v755_v45 = vsub.f32 %v3739_v2, %v727_v16 }
 0x103   : > { %v735_v17 = vpop.xlane.xlu1 %734  ;;  %v733_v18 = vpop.xlane.xlu0 %732 }
 0x104   : > { %v741_v21 = vmul.f32 0.0078125, %v735_v17  ;;  %v740_v22 = vmul.f32 0.0078125, %v733_v18 }
 0x106   : > { %v749_v23 = vsub.f32 %v741_v21, %v745_v20  ;;  %v748_v24 = vsub.f32 %v740_v22, %v744_v19 }
 0x107   : > { %v739_v27 = vpop.xlane.xlu1 %738  ;;  %v737_v28 = vpop.xlane.xlu0 %736 }
 0x108   : > { %v757_v29 = vadd.f32 1e-05, %v749_v23  ;;  %v756_v30 = vadd.f32 1e-05, %v748_v24  ;;  %v743_v31 = vmul.f32 0.0078125, %v739_v27  ;;  %v742_v32 = vmul.f32 0.0078125, %v737_v28 }
 0x10a   : > { %3136 = vrsqrt.f32 %v757_v29  ;;  %v751_v33 = vsub.f32 %v743_v31, %v747_v26  ;;  %v750_v34 = vsub.f32 %v742_v32, %v746_v25 }
 0x10b   : > { %3138 = vrsqrt.f32 %v756_v30 }
 0x10c   : > { %v759_v35 = vadd.f32 1e-05, %v751_v33  ;;  %v758_v36 = vadd.f32 1e-05, %v750_v34 }
 0x10e   : > { %3140 = vrsqrt.f32 %v759_v35 }
 0x10f   : > { %3142 = vrsqrt.f32 %v758_v36 }
 0x117   : > { %v3137_v38 = vpop.eup %3136 }
 0x118   : > { %v3139_v41 = vpop.eup %3138  ;;  %v765_v42 = vmul.f32 %v3137_v38, %v753_v37 }
 0x119   : > { %v764_v44 = vmul.f32 %v3139_v41, %v752_v39 }
 0x11a   : > { %v775_v46 = vmul.f32 %v2633_v40, %v765_v42 }
 0x11b   : > { %v3141_v47 = vpop.eup %3140  ;;  %v774_v49 = vmul.f32 %v2633_v40, %v764_v44 }
 0x11c   : > { %v3143_v50 = vpop.eup %3142  ;;  %v785_v51 = vadd.f32 %v2634_v43, %v775_v46  ;;  %v767_v52 = vmul.f32 %v3141_v47, %v755_v45 }
 0x11d   : > { %v784_v53 = vadd.f32 %v2634_v43, %v774_v49  ;;  %v766_v54 = vmul.f32 %v3143_v50, %v754_v48 }
 0x11e   : > { %789 = vst [vmem:[#allocation2] sm:$0xff] %v785_v51  ;;  %v777_v55 = vmul.f32 %v2633_v40, %v767_v52 }
 0x11f   : > { %788 = vst [vmem:[#allocation2 + $0x10] sm:$0xff] %v784_v53  ;;  %v776_v56 = vmul.f32 %v2633_v40, %v766_v54 }
 0x120   : > { %v787_v57 = vadd.f32 %v2634_v43, %v777_v55 }
 0x121   : > { %v786_v58 = vadd.f32 %v2634_v43, %v776_v56 }
 0x122   : > { %791 = vst [vmem:[#allocation2 + $0x8] sm:$0xff] %v787_v57 }
 0x123   : > { %790 = vst [vmem:[#allocation2 + $0x18] sm:$0xff] %v786_v58 }
 0x124 PF: > { %s2759_s5 = smul.u32 192, %s3620_s27  ;;  %v3503_v61 = vmov 0   ;;  %s4231_s21 = sld [smem:[#allocation24_spill]]  ;;  %v873_v18 = vlaneseq  ;;  %vm1134_vm0 = vcmask 257024   ;;  %vm1159_vm1 = vcmask 519424  }
 0x125   : > { %v3763_v60 = vld [vmem:[#allocation2] sm:$0xff]  ;;  %1048 = vmatprep.mubr.bf16.mxu0 %v3503_v61  ;;  %s869_s20 = smul.u32 3, %s3620_s27  ;;  %vm1168_vm2 = vcmask 781824   ;;  %vm1177_vm3 = vcmask 1044224   ;;  %s4232_s25 = sld [smem:[#allocation21_spill]] }
 0x126   : > { %v3761_v59 = vld [vmem:[#allocation2 + $0x10] sm:$0xff]  ;;  %v3800_v19 = vshrl.u32 %v873_v18, 7  ;;  %s4233_s3 = sld [smem:[#allocation20_spill]]  ;;  %s1675_s22 = scalar_lea.vmem %s4190_s9, %s3620_s27 }
 0x127   : > { %v867_v62 = vpack.c.bf16 %v3763_v60, %v3761_v59  ;;  %s870_s1 = scalar_lea.vmem %s4187_s6, %s869_s20  ;;  %s2773_s20 = sshll.u32 %s3620_s27, 7 }
 0x128   : > { %v879_v20 = vsub.s32 1, %v3800_v19  ;;  %v875_v21 = vsub.s32 0, %v3800_v19  ;;  %v3807_v22 = vld [vmem:[%s870_s1] sm:$0x7]  ;;  %s3976_s26 = scalar_lea.vmem %s4192_s11, %s2773_s20  ;;  %s3987_s4 = scalar_lea.vmem %s4194_s13, %s2773_s20 }
 0x129   : > { %2903 = vmatprep.mubr.bf16.mxu1 %v867_v62  ;;  %v3792_v16 = vld [vmem:[#allocation2 + $0x8] sm:$0xff]  ;;  %s1677_s20 = scalar_lea.vmem %s4191_s10, %s3620_s27  ;;  %s2700_s0 = sshll.u32 %s3620_s27, 1 }
 0x12a   : > { %s3771_s24 = scalar_lea.vmem %s4231_s21, %s2759_s5  ;;  %v3790_v15 = vld [vmem:[#allocation2 + $0x18] sm:$0xff]  ;;  %v880_v23 = vrot.slane %v3807_v22, %v879_v20  ;;  %v876_v25 = vrot.slane %v3807_v22, %v875_v21  ;;  %s2768_s5 = sshll.u32 %s3620_s27, 6 }
 0x12b   : > { %v3144_v63 = vld [vmem:[%s3771_s24 + $0xac] ss:$12 sps:$4 sm:$0xff]   ;;  %v3146_v0 = vld [vmem:[%s3771_s24 + $0xa8] ss:$12 sps:$4 sm:$0xff]   ;;  %v3149_v2 = vld [vmem:[%s3771_s24 + $0x90] ss:$12 sps:$4 sm:$0xff]   ;;  %v3796_v17 = vpack.c.bf16 %v3792_v16, %v3790_v15  ;;  %s3938_s21 = scalar_lea.vmem %s4188_s7, %s2768_s5 }
 0x12c   : > { %1016 = vmatprep.subr.bf16.mxu0 %v3144_v63  ;;  %v3147_v1 = vld [vmem:[%s3771_s24 + $0x94] ss:$12 sps:$4 sm:$0xff]   ;;  %v3150_v3 = vld [vmem:[%s3771_s24 + $0x7c] ss:$12 sps:$4 sm:$0xff]   ;;  %v3152_v4 = vld [vmem:[%s3771_s24 + $0x78] ss:$12 sps:$4 sm:$0xff]  }
 0x12d   : > { %1017 = vmatpush1.bf16.msra.mxu0 %v3146_v0  ;;  %v3153_v5 = vld [vmem:[%s3771_s24 + $0x64] ss:$12 sps:$4 sm:$0xff]   ;;  %v3155_v6 = vld [vmem:[%s3771_s24 + $0x60] ss:$12 sps:$4 sm:$0xff]   ;;  %v3158_v8 = vld [vmem:[%s3771_s24 + $0x48] ss:$12 sps:$4 sm:$0xff]  }
 0x12e   : > { %1018 = vmatprep.subr.bf16.mxu0 %v3147_v1  ;;  %v3156_v7 = vld [vmem:[%s3771_s24 + $0x4c] ss:$12 sps:$4 sm:$0xff]   ;;  %v3159_v9 = vld [vmem:[%s3771_s24 + $0x34] ss:$12 sps:$4 sm:$0xff]   ;;  %v3161_v10 = vld [vmem:[%s3771_s24 + $0x30] ss:$12 sps:$4 sm:$0xff]  }
 0x12f   : > { %v3162_v11 = vld [vmem:[%s3771_s24 + $0x1c] ss:$12 sps:$4 sm:$0xff]   ;;  %v3164_v12 = vld [vmem:[%s3771_s24 + $0x18] ss:$12 sps:$4 sm:$0xff]   ;;  %v3167_v14 = vld [vmem:[%s3771_s24] ss:$12 sps:$4 sm:$0xff]  }
 0x130   : > { %v3165_v13 = vld [vmem:[%s3771_s24 + $0x4] ss:$12 sps:$4 sm:$0xff]   ;;  %v3178_v57 = vld [vmem:[%s3771_s24 + $0x80] ss:$12 sps:$4 sm:$0xff]   ;;  %v3179_v58 = vld [vmem:[%s3771_s24 + $0x68] ss:$12 sps:$4 sm:$0xff]  }
 0x131   : > { %1019 = vmatpush1.bf16.msra.mxu0 %v3149_v2  ;;  %v3176_v55 = vld [vmem:[%s3771_s24 + $0xb0] ss:$12 sps:$4 sm:$0xff]   ;;  %v3177_v56 = vld [vmem:[%s3771_s24 + $0x98] ss:$12 sps:$4 sm:$0xff]   ;;  %v3182_v0 = vld [vmem:[%s3771_s24 + $0x20] ss:$12 sps:$4 sm:$0xff]  }
 0x132   : > { %1020 = vmatprep.subr.bf16.mxu0 %v3150_v3  ;;  %2887 = vmatprep.subr.bf16.mxu1 %v3176_v55  ;;  %v3181_v63 = vld [vmem:[%s3771_s24 + $0x38] ss:$12 sps:$4 sm:$0xff]   ;;  %v3183_v1 = vld [vmem:[%s3771_s24 + $0x8] ss:$12 sps:$4 sm:$0xff]   ;;  %s1774_s1 = scalar_lea.vmem [#allocation10], %s2700_s0  ;;  %p2738_p5 = scmp.ne.s32.totalorder %s3620_s27, 1 }
 0x133   : > { %2888 = vmatpush3.bf16.msra.mxu1 %v3176_v55  ;;  %v1336_v2 = vld [vmem:[%s4232_s25 + $0x78] sm:$0xff]  ;;  %v1335_v3 = vld [vmem:[%s4232_s25 + $0x70] sm:$0xff]  ;;  %s4234_s28 = sld [smem:[#allocation25_spill]] (!%p2738_p5) }
 0x134   : > { %2889 = vmatprep.subr.bf16.mxu1 %v3177_v56  ;;  %s4235_s29 = sld [smem:[#allocation26_spill]] (!%p2738_p5) }
 0x135   : > { %1021 = vmatpush1.bf16.msra.mxu0 %v3152_v4  ;;  %v1334_v4 = vld [vmem:[%s4232_s25 + $0x68] sm:$0xff] }
 0x136   : > { %1022 = vmatprep.subr.bf16.mxu0 %v3153_v5  ;;  %v1333_v5 = vld [vmem:[%s4232_s25 + $0x60] sm:$0xff] }
 0x137   : > { %2890 = vmatpush3.bf16.msra.mxu1 %v3177_v56 }
 0x138   : > { %2891 = vmatprep.subr.bf16.mxu1 %v3178_v57 }
 0x139   : > { %1023 = vmatpush1.bf16.msra.mxu0 %v3155_v6  ;;  %v830_v6 = vld [vmem:[%s4233_s3 + $0x10] sm:$0xff] }
 0x13a   : > { %1024 = vmatprep.subr.bf16.mxu0 %v3156_v7 }
 0x13b   : > { %2892 = vmatpush3.bf16.msra.mxu1 %v3178_v57 }
 0x13c   : > { %2893 = vmatprep.subr.bf16.mxu1 %v3179_v58 }
 0x13d   : > { %1025 = vmatpush1.bf16.msra.mxu0 %v3158_v8  ;;  %v828_v8 = vld [vmem:[%s4233_s3] sm:$0xff] }
 0x13e   : > { %1026 = vmatprep.subr.bf16.mxu0 %v3159_v9 }
 0x13f   : > { %2894 = vmatpush3.bf16.msra.mxu1 %v3179_v58 }
 0x141   : > { %1027 = vmatpush1.bf16.msra.mxu0 %v3161_v10 }
 0x142   : > { %1028 = vmatprep.subr.bf16.mxu0 %v3162_v11  ;;  %v831_v11 = vld [vmem:[%s4233_s3 + $0x18] sm:$0xff] }
 0x145   : > { %1029 = vmatpush1.bf16.msra.mxu0 %v3164_v12 }
 0x146   : > { %1030 = vmatprep.subr.bf16.mxu0 %v3165_v13 }
 0x149   : > { %1031 = vmatpush1.bf16.msra.mxu0 %v3167_v14  ;;  %v829_v14 = vld [vmem:[%s4233_s3 + $0x8] sm:$0xff] }
 0x14c   : > { %1049 = vmatmul.mubr.bf16.vlgmr.msra.gmra.mxu0 %v867_v62  ;;  %v3180_v62 = vld [vmem:[%s3771_s24 + $0x50] ss:$12 sps:$4 sm:$0xff]   ;;  %s2769_s24 = scalar_lea.vmem [#allocation9], %s3490_s2 }
 0x14d   : > { %1058 = vmatprep.mubr.bf16.mxu0 %v3503_v61  ;;  %2895 = vmatprep.subr.bf16.mxu1 %v3180_v62 }
 0x14e   : > { %2896 = vmatpush3.bf16.msra.mxu1 %v3180_v62 }
 0x14f   : > { %2897 = vmatprep.subr.bf16.mxu1 %v3181_v63 }
 0x152   : > { %2898 = vmatpush3.bf16.msra.mxu1 %v3181_v63 }
 0x153   : > { %2899 = vmatprep.subr.bf16.mxu1 %v3182_v0 }
 0x154   : > { %1059 = vmatmul.mubr.bf16.gmra.mxu0 %v3796_v17 }
 0x156   : > { %2900 = vmatpush3.bf16.msra.mxu1 %v3182_v0 }
 0x157   : > { %2901 = vmatprep.subr.bf16.mxu1 %v3183_v1 }
 0x15a   : > { %2902 = vmatpush3.bf16.msra.mxu1 %v3183_v1 }
 0x15b   : > { %2927 = vmatprep.subr.mxu1 %v1336_v2 }
 0x15d   : > { %2904 = vmatmul.mubr.bf16.vlgmr.msra.gmra.mxu1 %v3796_v17 }
 0x15e   : > { %2928 = vmatpush3.msra.mxu1 %v1336_v2 }
 0x15f   : > { %2929 = vmatprep.subr.mxu1 %v1335_v3 }
 0x160   : > { %2930 = vmatpush3.msra.mxu1 %v1335_v3 }
 0x161   : > { %2931 = vmatprep.subr.mxu1 %v1334_v4 }
 0x162   : > { %2932 = vmatpush3.msra.mxu1 %v1334_v4 }
 0x163   : > { %2933 = vmatprep.subr.mxu1 %v1333_v5 }
 0x164   : > { %2934 = vmatpush3.msra.mxu1 %v1333_v5 }
 0x20c   : > { %v1050_v24 = vpop.f32.mrf.mxu0 }
 0x20d   : > { %v1051_v29 = vadd.f32 %v1050_v24, %v876_v25  ;;  %v1332_v24 = vld [vmem:[%s4232_s25 + $0x58] sm:$0xff] }
 0x20e   : > { %v1052_v26 = vpop.f32.mrf.mxu0  ;;  %2935 = vmatprep.subr.mxu1 %v1332_v24 }
 0x20f   : > { %v1053_v27 = vadd.f32 %v1052_v26, %v880_v23  ;;  %2936 = vmatpush3.msra.mxu1 %v1332_v24  ;;  %v1330_v26 = vld [vmem:[%s4232_s25 + $0x48] sm:$0xff] }
 0x210   : > { %v1054_v28 = vpop.f32.mrf.mxu0 }
 0x211   : > { %v2760_v30 = vpack.c.bf16 %v1053_v27, %v1053_v27  ;;  %v1055_v31 = vadd.f32 %v1054_v28, %v876_v25  ;;  %v1329_v27 = vld [vmem:[%s4232_s25 + $0x40] sm:$0xff]  ;;  %v1328_v28 = vld [vmem:[%s4232_s25 + $0x38] sm:$0xff] }
 0x212   : > { %v1056_v32 = vpop.f32.mrf.mxu0 }
 0x213   : > { %1135 = vst.msk [vmem:[#allocation3] sm:$0xf] %vm1134_vm0, %v2760_v30  ;;  %v1186_v33 = vpack.c.bf16 %v1055_v31, %v1051_v29  ;;  %v1057_v34 = vadd.f32 %v1056_v32, %v880_v23  ;;  %v1327_v29 = vld [vmem:[%s4232_s25 + $0x30] sm:$0xff]  ;;  %v1325_v31 = vld [vmem:[%s4232_s25 + $0x20] sm:$0xff]  ;;  %v1324_v32 = vld [vmem:[%s4232_s25 + $0x18] sm:$0xff] }
 0x214   : > { %1160 = vst.msk [vmem:[#allocation3 + $0x10] sm:$0xf] %vm1159_vm1, %v2760_v30  ;;  %v1060_v35 = vpop.f32.mrf.mxu0 }
 0x215   : > { %1169 = vst.msk [vmem:[#allocation3 + $0x20] sm:$0xf] %vm1168_vm2, %v2760_v30  ;;  %v2761_v36 = vpack.c.bf16 %v1057_v34, %v1057_v34  ;;  %v1061_v37 = vadd.f32 %v1060_v35, %v876_v25  ;;  %2923 = vmatprep.mubr.bf16.mxu0 %v1186_v33  ;;  %v1323_v33 = vld [vmem:[%s4232_s25 + $0x10] sm:$0xff]  ;;  %v1322_v34 = vld [vmem:[%s4232_s25 + $0x8] sm:$0xff]  ;;  %v1321_v35 = vld [vmem:[%s4232_s25] sm:$0xff] }
 0x216   : > { %1178 = vst.msk [vmem:[#allocation3 + $0x30] sm:$0xf] %vm1177_vm3, %v2760_v30  ;;  %v1062_v38 = vpop.f32.mrf.mxu0  ;;  %v1326_v30 = vld [vmem:[%s4232_s25 + $0x28] sm:$0xff] }
 0x217   : > { %1136 = vst.msk [vmem:[#allocation3 + $0x4] sm:$0xf] %vm1134_vm0, %v2761_v36  ;;  %v1063_v39 = vadd.f32 %v1062_v38, %v880_v23 }
 0x218   : > { %1161 = vst.msk [vmem:[#allocation3 + $0x14] sm:$0xf] %vm1159_vm1, %v2761_v36  ;;  %v1064_v40 = vpop.f32.mrf.mxu0 }
 0x219   : > { %1170 = vst.msk [vmem:[#allocation3 + $0x24] sm:$0xf] %vm1168_vm2, %v2761_v36  ;;  %v2762_v41 = vpack.c.bf16 %v1063_v39, %v1063_v39  ;;  %v1065_v42 = vadd.f32 %v1064_v40, %v876_v25  ;;  %v1331_v25 = vld [vmem:[%s4232_s25 + $0x50] sm:$0xff] }
 0x21a   : > { %1179 = vst.msk [vmem:[#allocation3 + $0x34] sm:$0xf] %vm1177_vm3, %v2761_v36  ;;  %v1066_v43 = vpop.f32.mrf.mxu0  ;;  %2937 = vmatprep.subr.mxu1 %v1331_v25  ;;  %v883_v36 = vsub.s32 2, %v3800_v19 }
 0x21b   : > { %1137 = vst.msk [vmem:[#allocation3 + $0x8] sm:$0xf] %vm1134_vm0, %v2762_v41  ;;  %v1187_v44 = vpack.c.bf16 %v1065_v42, %v1061_v37  ;;  %v1067_v45 = vadd.f32 %v1066_v43, %v880_v23  ;;  %2938 = vmatpush3.msra.mxu1 %v1331_v25 }
 0x21c   : > { %1162 = vst.msk [vmem:[#allocation3 + $0x18] sm:$0xf] %vm1159_vm1, %v2762_v41  ;;  %2939 = vmatprep.subr.mxu1 %v1330_v26  ;;  %v884_v37 = vrot.slane %v3807_v22, %v883_v36 }
 0x21d   : > { %1171 = vst.msk [vmem:[#allocation3 + $0x28] sm:$0xf] %vm1168_vm2, %v2762_v41  ;;  %v2763_v46 = vpack.c.bf16 %v1067_v45, %v1067_v45  ;;  %2940 = vmatpush3.msra.mxu1 %v1330_v26  ;;  %v2905_v38 = vpop.f32.mrf.mxu1 }
 0x21e   : > { %1180 = vst.msk [vmem:[#allocation3 + $0x38] sm:$0xf] %vm1177_vm3, %v2762_v41  ;;  %v3175_v54 = vld [vmem:[#allocation3] sm:$0xff]   ;;  %2941 = vmatprep.subr.mxu1 %v1329_v27  ;;  %v1112_v39 = vadd.f32 %v2905_v38, %v884_v37  ;;  %v3198_v38 = vld [vmem:[%s3938_s21 + $0x8] sm:$0xff]  }
 0x21f   : > { %1138 = vst.msk [vmem:[#allocation3 + $0xc] sm:$0xf] %vm1134_vm0, %v2763_v46  ;;  %v3173_v52 = vld [vmem:[#allocation3 + $0x10] sm:$0xff]   ;;  %2942 = vmatpush3.msra.mxu1 %v1329_v27  ;;  %v1103_v40 = vpop.f32.mrf.mxu1 }
 0x220   : > { %1163 = vst.msk [vmem:[#allocation3 + $0x1c] sm:$0xf] %vm1159_vm1, %v2763_v46  ;;  %v3171_v50 = vld [vmem:[#allocation3 + $0x20] sm:$0xff]   ;;  %2943 = vmatprep.subr.mxu1 %v1328_v28  ;;  %v2766_v41 = vpack.c.bf16 %v1112_v39, %v1112_v39  ;;  %v1104_v42 = vadd.f32 %v1103_v40, %v884_v37 }
 0x221   : > { %1172 = vst.msk [vmem:[#allocation3 + $0x2c] sm:$0xf] %vm1168_vm2, %v2763_v46  ;;  %v3169_v48 = vld [vmem:[#allocation3 + $0x30] sm:$0xff]   ;;  %2944 = vmatpush3.msra.mxu1 %v1328_v28  ;;  %v2906_v43 = vpop.f32.mrf.mxu1  ;;  %v3199_v39 = vld [vmem:[%s3938_s21] sm:$0xff]  }
 0x222   : > { %1181 = vst.msk [vmem:[#allocation3 + $0x3c] sm:$0xf] %vm1177_vm3, %v2763_v46  ;;  %2945 = vmatprep.subr.mxu1 %v1327_v29  ;;  %1184 = vst.msk [vmem:[#allocation4 + $0x38] sm:$0xf] %vm1177_vm3, %v2766_v41  ;;  %v1115_v45 = vadd.f32 %v2906_v43, %v884_v37 }
 0x223   : > { %2946 = vmatpush3.msra.mxu1 %v1327_v29  ;;  %1157 = vst.msk [vmem:[#allocation4 + $0x8] sm:$0xf] %vm1134_vm0, %v2766_v41  ;;  %v1106_v46 = vpop.f32.mrf.mxu1 }
 0x224   : > { %2947 = vmatprep.subr.mxu1 %v1326_v30  ;;  %1166 = vst.msk [vmem:[#allocation4 + $0x18] sm:$0xf] %vm1159_vm1, %v2766_v41  ;;  %v2767_v22 = vpack.c.bf16 %v1115_v45, %v1115_v45 }
 0x225   : > { %2948 = vmatpush3.msra.mxu1 %v1326_v30  ;;  %1175 = vst.msk [vmem:[#allocation4 + $0x28] sm:$0xf] %vm1168_vm2, %v2766_v41 }
 0x226   : > { %v3174_v53 = vld [vmem:[#allocation3 + $0x8] sm:$0xff]   ;;  %2949 = vmatprep.subr.mxu1 %v1325_v31  ;;  %1158 = vst.msk [vmem:[#allocation4 + $0xc] sm:$0xf] %vm1134_vm0, %v2767_v22 }
 0x227   : > { %v3172_v51 = vld [vmem:[#allocation3 + $0x18] sm:$0xff]   ;;  %2950 = vmatpush3.msra.mxu1 %v1325_v31  ;;  %1167 = vst.msk [vmem:[#allocation4 + $0x1c] sm:$0xf] %vm1159_vm1, %v2767_v22 }
 0x228   : > { %v3170_v49 = vld [vmem:[#allocation3 + $0x28] sm:$0xff]   ;;  %2951 = vmatprep.subr.mxu1 %v1324_v32  ;;  %1176 = vst.msk [vmem:[#allocation4 + $0x2c] sm:$0xf] %vm1168_vm2, %v2767_v22 }
 0x229   : > { %v3168_v47 = vld [vmem:[#allocation3 + $0x38] sm:$0xff]   ;;  %2952 = vmatpush3.msra.mxu1 %v1324_v32  ;;  %1185 = vst.msk [vmem:[#allocation4 + $0x3c] sm:$0xf] %vm1177_vm3, %v2767_v22 }
 0x22a   : > { %2907 = vmatprep.subr.bf16.mxu0 %v3168_v47  ;;  %2953 = vmatprep.subr.mxu1 %v1323_v33  ;;  %v2772_v22 = vld [vmem:[%s2769_s24 - $0x1] ss:$0 sm:$0xff] }
 0x22b   : > { %2908 = vmatpush3.bf16.xpose.msra.mxu0 %v3168_v47  ;;  %2954 = vmatpush3.msra.mxu1 %v1323_v33  ;;  %v1107_v47 = vadd.f32 %v1106_v46, %v884_v37 }
 0x22c   : > { %2909 = vmatprep.subr.bf16.mxu0 %v3169_v48  ;;  %2955 = vmatprep.subr.mxu1 %v1322_v34 }
 0x22d   : > { %2956 = vmatpush3.msra.mxu1 %v1322_v34 }
 0x22e   : > { %2957 = vmatprep.subr.mxu1 %v1321_v35 }
 0x22f   : > { %2958 = vmatpush3.msra.mxu1 %v1321_v35  ;;  %v3186_v5 = vld [vmem:[#allocation4 + $0x28] sm:$0xff]  }
 0x233   : > { %2910 = vmatpush3.bf16.xpose.msra.mxu0 %v3169_v48  ;;  %v2765_v48 = vpack.c.bf16 %v1107_v47, %v1107_v47 }
 0x234   : > { %2911 = vmatprep.subr.bf16.mxu0 %v3170_v49 }
 0x235   : > { %1156 = vst.msk [vmem:[#allocation4 + $0x4] sm:$0xf] %vm1134_vm0, %v2765_v48 }
 0x236   : > { %1165 = vst.msk [vmem:[#allocation4 + $0x14] sm:$0xf] %vm1159_vm1, %v2765_v48 }
 0x237   : > { %1174 = vst.msk [vmem:[#allocation4 + $0x24] sm:$0xf] %vm1168_vm2, %v2765_v48 }
 0x238   : > { %1183 = vst.msk [vmem:[#allocation4 + $0x34] sm:$0xf] %vm1177_vm3, %v2765_v48 }
 0x23b   : > { %2912 = vmatpush3.bf16.xpose.msra.mxu0 %v3170_v49  ;;  %v3184_v49 = vld [vmem:[#allocation4 + $0x38] sm:$0xff]  }
 0x23c   : > { %2913 = vmatprep.subr.bf16.mxu0 %v3171_v50  ;;  %2965 = vmatprep.subr.bf16.mxu1 %v3184_v49 }
 0x243   : > { %2914 = vmatpush3.bf16.xpose.msra.mxu0 %v3171_v50 }
 0x244   : > { %2915 = vmatprep.subr.bf16.mxu0 %v3172_v51 }
 0x24b   : > { %2916 = vmatpush3.bf16.xpose.msra.mxu0 %v3172_v51 }
 0x24c   : > { %2917 = vmatprep.subr.bf16.mxu0 %v3173_v52 }
 0x253   : > { %2918 = vmatpush3.bf16.xpose.msra.mxu0 %v3173_v52 }
 0x254   : > { %2919 = vmatprep.subr.bf16.mxu0 %v3174_v53 }
 0x25b   : > { %2920 = vmatpush3.bf16.xpose.msra.mxu0 %v3174_v53 }
 0x25c   : > { %2921 = vmatprep.subr.bf16.mxu0 %v3175_v54 }
 0x263   : > { %2922 = vmatpush3.bf16.xpose.msra.mxu0 %v3175_v54 }
 0x26a   : > { %2924 = vmatmul.mubr.bf16.vlgmr.msra.gmra.mxu0 %v1187_v44  ;;  %v2764_v44 = vpack.c.bf16 %v1104_v42, %v1104_v42 }
 0x26c   : > { %1155 = vst.msk [vmem:[#allocation4] sm:$0xf] %vm1134_vm0, %v2764_v44 }
 0x26d   : > { %1164 = vst.msk [vmem:[#allocation4 + $0x10] sm:$0xf] %vm1159_vm1, %v2764_v44 }
 0x26e   : > { %1173 = vst.msk [vmem:[#allocation4 + $0x20] sm:$0xf] %vm1168_vm2, %v2764_v44 }
 0x26f   : > { %1182 = vst.msk [vmem:[#allocation4 + $0x30] sm:$0xf] %vm1177_vm3, %v2764_v44 }
 0x276   : > { %v3185_v2 = vld [vmem:[#allocation4 + $0x30] sm:$0xff]  }
 0x32a   : > { %v2925_v7 = vpop.f32.mrf.mxu0 }
 0x32b   : > { %v3858_v9 = vadd.f32 %v2925_v7, %v830_v6  ;;  %v3187_v7 = vld [vmem:[#allocation4 + $0x20] sm:$0xff]  }
 0x32c   : > { %v1286_v10 = vpop.f32.mrf.mxu0 }
 0x32d   : > { %v3863_v12 = vadd.f32 %v1286_v10, %v828_v8  ;;  %1305 = vmax.xlane.f32.xlu1 %v3858_v9  ;;  %v3188_v8 = vld [vmem:[#allocation4 + $0x18] sm:$0xff]   ;;  %v3190_v10 = vld [vmem:[#allocation4 + $0x8] sm:$0xff]  }
 0x32e   : > { %v2926_v13 = vpop.f32.mrf.mxu0 }
 0x32f   : > { %v3869_v17 = vadd.f32 %v2926_v13, %v831_v11  ;;  %1301 = vmax.xlane.f32.xlu0 %v3863_v12  ;;  %v3191_v11 = vld [vmem:[#allocation4] sm:$0xff]   ;;  %v3193_v13 = vld [vmem:[%s3938_s21 + $0x30] sm:$0xff]  }
 0x330   : > { %v1289_v18 = vpop.f32.mrf.mxu0 }
 0x331   : > { %v3872_v23 = vadd.f32 %v1289_v18, %v829_v14  ;;  %1307 = vmax.xlane.f32.xlu1 %v3869_v17  ;;  %v3194_v14 = vld [vmem:[%s3938_s21 + $0x28] sm:$0xff]   ;;  %v3196_v18 = vld [vmem:[%s3938_s21 + $0x18] sm:$0xff]  }
 0x333   : > { %1303 = vmax.xlane.f32.xlu0 %v3872_v23 }
 0x3b6   : > { %v1306_v50 = vpop.xlane.xlu1 %1305 }
 0x3b7   : > { %v1311_v53 = vsub.f32 %v3858_v9, %v1306_v50  ;;  %v3189_v9 = vld [vmem:[#allocation4 + $0x10] sm:$0xff]  }
 0x3b8   : > { %v1302_v51 = vpop.xlane.xlu0 %1301 }
 0x3b9   : > { %v1309_v52 = vsub.f32 %v3863_v12, %v1302_v51  ;;  %v1317_v62 = vmul.f32 1.442695, %v1311_v53  ;;  %v3192_v12 = vld [vmem:[%s3938_s21 + $0x38] sm:$0xff]  }
 0x3ba   : > { %v1308_v54 = vpop.xlane.xlu1 %1307  ;;  %2985 = vmatprep.subr.bf16.mxu0 %v3192_v12 }
 0x3bb   : > { %v1313_v55 = vmul.f32 1.442695, %v1309_v52  ;;  %v1312_v57 = vsub.f32 %v3869_v17, %v1308_v54  ;;  %2986 = vmatpush3.bf16.msra.mxu0 %v3192_v12  ;;  %v3195_v17 = vld [vmem:[%s3938_s21 + $0x20] sm:$0xff]  }
 0x3bc   : > { %v1304_v56 = vpop.xlane.xlu0 %1303  ;;  %2987 = vmatprep.subr.bf16.mxu0 %v3193_v13  ;;  %v3221_v12 = vld [vmem:[%s3976_s26] ss:$8 sps:$4 sm:$0xff]  }
 0x3bd   : > { %3240 = vpow2.f32 %v1313_v55  ;;  %v1310_v58 = vsub.f32 %v3872_v23, %v1304_v56  ;;  %v1319_v0 = vmul.f32 1.442695, %v1312_v57  ;;  %v3197_v23 = vld [vmem:[%s3938_s21 + $0x10] sm:$0xff]  }
 0x3bf   : > { %v1315_v63 = vmul.f32 1.442695, %v1310_v58  ;;  %2988 = vmatpush3.bf16.msra.mxu0 %v3193_v13 }
 0x3c0   : > { %2989 = vmatprep.subr.bf16.mxu0 %v3194_v14 }
 0x3c1   : > { %3242 = vpow2.f32 %v1315_v63  ;;  %v3205_v63 = vld [vmem:[%s3976_s26 + $0x64] ss:$8 sps:$4 sm:$0xff]  }
 0x3c2   : > { %3244 = vpow2.f32 %v1317_v62  ;;  %v3200_v62 = vld [vmem:[%s3976_s26 + $0x70] ss:$8 sps:$4 sm:$0xff]  }
 0x3c3   : > { %3246 = vpow2.f32 %v1319_v0  ;;  %2990 = vmatpush3.bf16.msra.mxu0 %v3194_v14  ;;  %v3203_v0 = vld [vmem:[%s3976_s26 + $0x60] ss:$8 sps:$4 sm:$0xff]  }
 0x3c4   : > { %2991 = vmatprep.subr.bf16.mxu0 %v3195_v17 }
 0x3c7   : > { %2992 = vmatpush3.bf16.msra.mxu0 %v3195_v17 }
 0x3c8   : > { %2993 = vmatprep.subr.bf16.mxu0 %v3196_v18 }
 0x3ca   : > { %v3241_v1 = vpop.eup %3240 }
 0x3cb   : > { %2959 = vmatprep.mubr.f32.mxu1 %v3241_v1  ;;  %2994 = vmatpush3.bf16.msra.mxu0 %v3196_v18 }
 0x3cc   : > { %2995 = vmatprep.subr.bf16.mxu0 %v3197_v23 }
 0x3ce   : > { %v3243_v3 = vpop.eup %3242 }
 0x3cf   : > { %v3245_v4 = vpop.eup %3244  ;;  %2960 = vmatmul.mubr.f32.vlgmr.msra.gmra.mxu1 %v3243_v3  ;;  %2996 = vmatpush3.bf16.msra.mxu0 %v3197_v23 }
 0x3d0   : > { %2962 = vmatprep.mubr.f32.mxu1 %v3245_v4  ;;  %2966 = vmatpush3.bf16.msra.mxu1 %v3184_v49  ;;  %v3247_v6 = vpop.eup %3246 }
 0x3d1   : > { %2967 = vmatprep.subr.bf16.mxu1 %v3185_v2  ;;  %2997 = vmatprep.subr.bf16.mxu0 %v3198_v38 }
 0x3d3   : > { %2963 = vmatmul.mubr.f32.gmra.mxu1 %v3247_v6  ;;  %2998 = vmatpush3.bf16.msra.mxu0 %v3198_v38 }
 0x3d4   : > { %2968 = vmatpush3.bf16.msra.mxu1 %v3185_v2  ;;  %2999 = vmatprep.subr.bf16.mxu0 %v3199_v39  ;;  %v3206_v2 = vld [vmem:[%s3976_s26 + $0x50] ss:$8 sps:$4 sm:$0xff]  }
 0x3d5   : > { %2969 = vmatprep.subr.bf16.mxu1 %v3186_v5 }
 0x3d7   : > { %3000 = vmatpush3.bf16.msra.mxu0 %v3199_v39 }
 0x3d8   : > { %2970 = vmatpush3.bf16.msra.mxu1 %v3186_v5  ;;  %v3214_v5 = vld [vmem:[%s3976_s26 + $0x34] ss:$8 sps:$4 sm:$0xff]  }
 0x3d9   : > { %2971 = vmatprep.subr.bf16.mxu1 %v3187_v7 }
 0x3dc   : > { %2972 = vmatpush3.bf16.msra.mxu1 %v3187_v7  ;;  %v3217_v7 = vld [vmem:[%s3976_s26 + $0x24] ss:$8 sps:$4 sm:$0xff]  }
 0x3dd   : > { %2973 = vmatprep.subr.bf16.mxu1 %v3188_v8 }
 0x3e0   : > { %2974 = vmatpush3.bf16.msra.mxu1 %v3188_v8  ;;  %v3215_v8 = vld [vmem:[%s3976_s26 + $0x20] ss:$8 sps:$4 sm:$0xff]  }
 0x3e1   : > { %2975 = vmatprep.subr.bf16.mxu1 %v3189_v9 }
 0x3e4   : > { %2976 = vmatpush3.bf16.msra.mxu1 %v3189_v9  ;;  %v3220_v9 = vld [vmem:[%s3976_s26 + $0x14] ss:$8 sps:$4 sm:$0xff]  }
 0x3e5   : > { %2977 = vmatprep.subr.bf16.mxu1 %v3190_v10 }
 0x3e8   : > { %2978 = vmatpush3.bf16.msra.mxu1 %v3190_v10  ;;  %v3218_v10 = vld [vmem:[%s3976_s26 + $0x10] ss:$8 sps:$4 sm:$0xff]  }
 0x3e9   : > { %2979 = vmatprep.subr.bf16.mxu1 %v3191_v11 }
 0x3ec   : > { %2980 = vmatpush3.bf16.msra.mxu1 %v3191_v11  ;;  %v3223_v11 = vld [vmem:[%s3976_s26 + $0x4] ss:$8 sps:$4 sm:$0xff]  }
 0x48f   : > { %v2961_v24 = vpop.f32.mrf.mxu1 }
 0x490   : > { %3248 = vrcp.f32 %v2961_v24 }
 0x491   : > { %v1403_v25 = vpop.f32.mrf.mxu1 }
 0x492   : > { %3250 = vrcp.f32 %v1403_v25 }
 0x493   : > { %v2964_v26 = vpop.f32.mrf.mxu1 }
 0x494   : > { %3252 = vrcp.f32 %v2964_v26 }
 0x495   : > { %v1413_v27 = vpop.f32.mrf.mxu1 }
 0x496   : > { %3254 = vrcp.f32 %v1413_v27 }
 0x49d   : > { %v3249_v28 = vpop.eup %3248 }
 0x49e   : > { %v1427_v31 = vmul.f32 %v3249_v28, %v3243_v3  ;;  %v3211_v3 = vld [vmem:[%s3976_s26 + $0x44] ss:$8 sps:$4 sm:$0xff]  }
 0x49f   : > { %v3251_v29 = vpop.eup %3250 }
 0x4a0   : > { %v1426_v30 = vmul.f32 %v3251_v29, %v3241_v1  ;;  %v3208_v1 = vld [vmem:[%s3976_s26 + $0x54] ss:$8 sps:$4 sm:$0xff]  }
 0x4a1   : > { %v3253_v32 = vpop.eup %3252 }
 0x4a2   : > { %v1446_v33 = vpack.c.bf16 %v1427_v31, %v1426_v30  ;;  %v1429_v36 = vmul.f32 %v3253_v32, %v3247_v6  ;;  %v3212_v6 = vld [vmem:[%s3976_s26 + $0x30] ss:$8 sps:$4 sm:$0xff]  }
 0x4a3   : > { %v3255_v34 = vpop.eup %3254 }
 0x4a4   : > { %2981 = vmatprep.mubr.bf16.mxu1 %v1446_v33  ;;  %v1428_v35 = vmul.f32 %v3255_v34, %v3245_v4  ;;  %v3209_v4 = vld [vmem:[%s3976_s26 + $0x40] ss:$8 sps:$4 sm:$0xff]  }
 0x4a6   : > { %v1447_v37 = vpack.c.bf16 %v1429_v36, %v1428_v35 }
 0x4a8   : > { %2982 = vmatmul.mubr.bf16.vlgmr.msra.gmra.mxu1 %v1447_v37 }
 0x4a9   : > { %1899 = vmatprep.mubr.bf16.mxu1 %v3503_v61 }
 0x568   : > { %v2983_v40 = vpop.f32.mrf.mxu1 }
 0x56a   : > { %v1530_v41 = vpop.f32.mrf.mxu1 }
 0x56c   : > { %v2984_v42 = vpop.f32.mrf.mxu1 }
 0x56d   : > { %v1565_v45 = vpack.c.bf16 %v2984_v42, %v2983_v40 }
 0x56e   : > { %v1533_v43 = vpop.f32.mrf.mxu1 }
 0x56f   : > { %v1564_v44 = vpack.c.bf16 %v1533_v43, %v1530_v41 }
 0x571   : > { %3001 = vmatprep.mubr.bf16.mxu0 %v1564_v44 }
 0x572   : > { %3002 = vmatmul.mubr.bf16.vlgmr.msra.gmra.mxu0 %v1565_v45 }
 0x632   : > { %v3003_v46 = vpop.f32.mrf.mxu0 }
 0x633   : > { %v1665_v53 = vadd.f32 %v3003_v46, %v2772_v22 }
 0x634   : > { %v1656_v47 = vpop.f32.mrf.mxu0 }
 0x635   : > { %v1657_v48 = vadd.f32 %v2772_v22, %v1656_v47  ;;  %v3961_v56 = vadd.f32 %v1665_v53, %v3790_v15 }
 0x636   : > { %v3004_v49 = vpop.f32.mrf.mxu0 }
 0x637   : > { %v3951_v50 = vadd.f32 %v1657_v48, %v3761_v59  ;;  %v1668_v59 = vadd.f32 %v3004_v49, %v2772_v22  ;;  %v2696_v49 = vld [vmem:[%s1675_s22] ss:$0 sm:$0xff]  ;;  %s2189_s22 = scalar_lea.vmem %s4197_s16, %s3620_s27 }
 0x638   : > { %v1659_v51 = vpop.f32.mrf.mxu0 }
 0x639   : > { %v1660_v52 = vadd.f32 %v2772_v22, %v1659_v51  ;;  %1679 = vadd.xlane.f32.xlu0 %v3951_v50  ;;  %v1692_v55 = vmul.f32 %v3951_v50, %v3951_v50  ;;  %v3967_v58 = vadd.f32 %v1668_v59, %v3792_v16  ;;  %v3202_v16 = vld [vmem:[%s3976_s26 + $0x74] ss:$8 sps:$4 sm:$0xff]   ;;  %v2697_v59 = vld [vmem:[%s1677_s20] ss:$0 sm:$0xff]  ;;  %s2775_s26 = scalar_lea.vmem [#allocation12], %s3490_s2 }
 0x63a   : > { %1867 = vmatprep.subr.bf16.mxu1 %v3202_v16 }
 0x63b   : > { %v3955_v54 = vadd.f32 %v1660_v52, %v3763_v60  ;;  %v1694_v60 = vmul.f32 %v3961_v56, %v3961_v56  ;;  %v1695_v15 = vmul.f32 %v3967_v58, %v3967_v58  ;;  %1868 = vmatpush1.bf16.msra.mxu1 %v3200_v62 }
 0x63c   : > { %1869 = vmatprep.subr.bf16.mxu1 %v3205_v63 }
 0x63d   : > { %1681 = vadd.xlane.f32.xlu1 %v3955_v54  ;;  %1696 = vadd.xlane.f32.xlu0 %v1692_v55  ;;  %v1693_v57 = vmul.f32 %v3955_v54, %v3955_v54 }
 0x63f   : > { %1870 = vmatpush1.bf16.msra.mxu1 %v3203_v0 }
 0x640   : > { %1871 = vmatprep.subr.bf16.mxu1 %v3208_v1 }
 0x641   : > { %1698 = vadd.xlane.f32.xlu1 %v1693_v57  ;;  %1683 = vadd.xlane.f32.xlu0 %v3961_v56 }
 0x643   : > { %1872 = vmatpush1.bf16.msra.mxu1 %v3206_v2 }
 0x644   : > { %1873 = vmatprep.subr.bf16.mxu1 %v3211_v3 }
 0x645   : > { %1685 = vadd.xlane.f32.xlu1 %v3967_v58  ;;  %1700 = vadd.xlane.f32.xlu0 %v1694_v60 }
 0x647   : > { %1874 = vmatpush1.bf16.msra.mxu1 %v3209_v4 }
 0x648   : > { %1875 = vmatprep.subr.bf16.mxu1 %v3214_v5  ;;  %v3224_v5 = vld [vmem:[%s3987_s4 + $0x78] sm:$0xff]  }
 0x649   : > { %1702 = vadd.xlane.f32.xlu1 %v1695_v15  ;;  %2839 = vmatprep.subr.bf16.mxu0 %v3224_v5 }
 0x64b   : > { %1876 = vmatpush1.bf16.msra.mxu1 %v3212_v6  ;;  %v3225_v6 = vld [vmem:[%s3987_s4 + $0x38] sm:$0xff]  }
 0x64c   : > { %1877 = vmatprep.subr.bf16.mxu1 %v3217_v7  ;;  %2840 = vmatpush3.bf16.msra.mxu0 %v3225_v6  ;;  %v3227_v7 = vld [vmem:[%s3987_s4 + $0x30] sm:$0xff]  }
 0x64f   : > { %1878 = vmatpush1.bf16.msra.mxu1 %v3215_v8  ;;  %v3228_v8 = vld [vmem:[%s3987_s4 + $0x68] sm:$0xff]  }
 0x650   : > { %1879 = vmatprep.subr.bf16.mxu1 %v3220_v9  ;;  %v3229_v9 = vld [vmem:[%s3987_s4 + $0x28] sm:$0xff]  }
 0x653   : > { %1880 = vmatpush1.bf16.msra.mxu1 %v3218_v10  ;;  %v3230_v10 = vld [vmem:[%s3987_s4 + $0x60] sm:$0xff]  }
 0x654   : > { %1881 = vmatprep.subr.bf16.mxu1 %v3223_v11  ;;  %v3231_v11 = vld [vmem:[%s3987_s4 + $0x20] sm:$0xff]  }
 0x657   : > { %1882 = vmatpush1.bf16.msra.mxu1 %v3221_v12  ;;  %v3232_v12 = vld [vmem:[%s3987_s4 + $0x58] sm:$0xff]  }
 0x658   : > { %3045 = vmatprep.subr.bf16.mxu1 %v3224_v5 }
 0x6c2   : > { %v1680_v13 = vpop.xlane.xlu0 %1679 }
 0x6c3   : > { %v1688_v14 = vmul.f32 0.0078125, %v1680_v13  ;;  %v3233_v13 = vld [vmem:[%s3987_s4 + $0x18] sm:$0xff]  }
 0x6c5   : > { %v1708_v23 = vmul.f32 %v1688_v14, %v1688_v14  ;;  %v1716_v22 = vsub.f32 %v3951_v50, %v1688_v14  ;;  %v3234_v14 = vld [vmem:[%s3987_s4 + $0x50] sm:$0xff]  }
 0x6c6   : > { %v1682_v17 = vpop.xlane.xlu1 %1681  ;;  %v1697_v18 = vpop.xlane.xlu0 %1696 }
 0x6c7   : > { %v1689_v24 = vmul.f32 0.0078125, %v1682_v17  ;;  %v1704_v25 = vmul.f32 0.0078125, %v1697_v18  ;;  %v3235_v17 = vld [vmem:[%s3987_s4 + $0x10] sm:$0xff]   ;;  %v3236_v18 = vld [vmem:[%s3987_s4 + $0x48] sm:$0xff]  }
 0x6c9   : > { %v1712_v26 = vsub.f32 %v1704_v25, %v1708_v23  ;;  %v1709_v29 = vmul.f32 %v1689_v24, %v1689_v24  ;;  %v1717_v51 = vsub.f32 %v3955_v54, %v1689_v24  ;;  %v3237_v23 = vld [vmem:[%s3987_s4 + $0x8] sm:$0xff]   ;;  %v3238_v24 = vld [vmem:[%s3987_s4 + $0x40] sm:$0xff]  }
 0x6ca   : > { %v1699_v27 = vpop.xlane.xlu1 %1698  ;;  %v1684_v28 = vpop.xlane.xlu0 %1683  ;;  %v3239_v25 = vld [vmem:[%s3987_s4] sm:$0xff]  }
 0x6cb   : > { %v1720_v30 = vadd.f32 1e-05, %v1712_v26  ;;  %v1705_v31 = vmul.f32 0.0078125, %v1699_v27  ;;  %v1690_v32 = vmul.f32 0.0078125, %v1684_v28  ;;  %v1775_v26 = vld [vmem:[%s1774_s1] sm:$0x3] }
 0x6cc   : > { %v1780_v27 = vrot.slane %v1775_v26, %v875_v21  ;;  %v1784_v28 = vrot.slane %v1775_v26, %v879_v20 }
 0x6cd   : > { %3256 = vrsqrt.f32 %v1720_v30  ;;  %v1713_v33 = vsub.f32 %v1705_v31, %v1709_v29  ;;  %v1710_v37 = vmul.f32 %v1690_v32, %v1690_v32  ;;  %v1718_v50 = vsub.f32 %v3961_v56, %v1690_v32 }
 0x6ce   : > { %v1686_v34 = vpop.xlane.xlu1 %1685  ;;  %v1701_v35 = vpop.xlane.xlu0 %1700 }
 0x6cf   : > { %v1721_v36 = vadd.f32 1e-05, %v1713_v33  ;;  %v1691_v38 = vmul.f32 0.0078125, %v1686_v34  ;;  %v1706_v39 = vmul.f32 0.0078125, %v1701_v35 }
 0x6d1   : > { %3258 = vrsqrt.f32 %v1721_v36  ;;  %v1714_v40 = vsub.f32 %v1706_v39, %v1710_v37  ;;  %v1711_v42 = vmul.f32 %v1691_v38, %v1691_v38  ;;  %v1719_v54 = vsub.f32 %v3967_v58, %v1691_v38 }
 0x6d2   : > { %v1703_v41 = vpop.xlane.xlu1 %1702 }
 0x6d3   : > { %v1722_v43 = vadd.f32 1e-05, %v1714_v40  ;;  %v1707_v44 = vmul.f32 0.0078125, %v1703_v41 }
 0x6d5   : > { %3260 = vrsqrt.f32 %v1722_v43  ;;  %v1715_v45 = vsub.f32 %v1707_v44, %v1711_v42 }
 0x6d7   : > { %v1723_v46 = vadd.f32 1e-05, %v1715_v45 }
 0x6d9   : > { %3262 = vrsqrt.f32 %v1723_v46 }
 0x6da   : > { %v3257_v47 = vpop.eup %3256 }
 0x6db   : > { %v1728_v48 = vmul.f32 %v3257_v47, %v1716_v22 }
 0x6dd   : > { %v1738_v55 = vmul.f32 %v2696_v49, %v1728_v48 }
 0x6de   : > { %v3259_v52 = vpop.eup %3258 }
 0x6df   : > { %v1729_v53 = vmul.f32 %v3259_v52, %v1717_v51  ;;  %v4012_v15 = vadd.f32 %v2697_v59, %v1738_v55 }
 0x6e1   : > { %v1739_v57 = vmul.f32 %v2696_v49, %v1729_v53 }
 0x6e2   : > { %v3261_v60 = vpop.eup %3260 }
 0x6e3   : > { %v4014_v16 = vadd.f32 %v2697_v59, %v1739_v57  ;;  %v1730_v62 = vmul.f32 %v3261_v60, %v1718_v50 }
 0x6e5   : > { %v1771_v63 = vpack.c.bf16 %v4014_v16, %v4012_v15  ;;  %v1740_v56 = vmul.f32 %v2696_v49, %v1730_v62 }
 0x6e6   : > { %v3263_v0 = vpop.eup %3262 }
 0x6e7   : > { %1900 = vmatmul.mubr.bf16.vlgmr.msra.gmra.mxu1 %v1771_v63  ;;  %v1731_v1 = vmul.f32 %v3263_v0, %v1719_v54  ;;  %v4020_v3 = vadd.f32 %v2697_v59, %v1740_v56 }
 0x6e8   : > { %1909 = vmatprep.mubr.bf16.mxu1 %v3503_v61  ;;  %3053 = vmatpush3.bf16.msra.mxu1 %v3225_v6  ;;  %v3226_v61 = vld [vmem:[%s3987_s4 + $0x70] sm:$0xff]   ;;  %s2187_s4 = scalar_lea.vmem %s4196_s15, %s3620_s27 }
 0x6e9   : > { %v1741_v2 = vmul.f32 %v2696_v49, %v1731_v1  ;;  %2841 = vmatprep.subr.bf16.mxu0 %v3226_v61  ;;  %3046 = vmatprep.subr.bf16.mxu1 %v3226_v61 }
 0x6ea   : > { %2842 = vmatpush3.bf16.msra.mxu0 %v3227_v7 }
 0x6eb   : > { %v4022_v4 = vadd.f32 %v2697_v59, %v1741_v2  ;;  %2843 = vmatprep.subr.bf16.mxu0 %v3228_v8 }
 0x6ec   : > { %3054 = vmatpush3.bf16.msra.mxu1 %v3227_v7 }
 0x6ed   : > { %v1772_v58 = vpack.c.bf16 %v4022_v4, %v4020_v3  ;;  %3047 = vmatprep.subr.bf16.mxu1 %v3228_v8 }
 0x6ee   : > { %2844 = vmatpush3.bf16.msra.mxu0 %v3229_v9 }
 0x6ef   : > { %1910 = vmatmul.mubr.bf16.gmra.mxu1 %v1772_v58  ;;  %2845 = vmatprep.subr.bf16.mxu0 %v3230_v10 }
 0x6f0   : > { %3055 = vmatpush3.bf16.msra.mxu1 %v3229_v9 }
 0x6f1   : > { %3048 = vmatprep.subr.bf16.mxu1 %v3230_v10 }
 0x6f2   : > { %2846 = vmatpush3.bf16.msra.mxu0 %v3231_v11 }
 0x6f3   : > { %2847 = vmatprep.subr.bf16.mxu0 %v3232_v12 }
 0x6f4   : > { %3056 = vmatpush3.bf16.msra.mxu1 %v3231_v11 }
 0x6f5   : > { %3049 = vmatprep.subr.bf16.mxu1 %v3232_v12 }
 0x6f6   : > { %2848 = vmatpush3.bf16.msra.mxu0 %v3233_v13 }
 0x6f7   : > { %2849 = vmatprep.subr.bf16.mxu0 %v3234_v14 }
 0x6f8   : > { %3057 = vmatpush3.bf16.msra.mxu1 %v3233_v13 }
 0x6f9   : > { %3050 = vmatprep.subr.bf16.mxu1 %v3234_v14 }
 0x6fa   : > { %2850 = vmatpush3.bf16.msra.mxu0 %v3235_v17 }
 0x6fb   : > { %2851 = vmatprep.subr.bf16.mxu0 %v3236_v18 }
 0x6fc   : > { %3058 = vmatpush3.bf16.msra.mxu1 %v3235_v17 }
 0x6fd   : > { %3051 = vmatprep.subr.bf16.mxu1 %v3236_v18 }
 0x6fe   : > { %2852 = vmatpush3.bf16.msra.mxu0 %v3237_v23 }
 0x6ff   : > { %2853 = vmatprep.subr.bf16.mxu0 %v3238_v24 }
 0x700   : > { %3059 = vmatpush3.bf16.msra.mxu1 %v3237_v23 }
 0x701   : > { %3052 = vmatprep.subr.bf16.mxu1 %v3238_v24 }
 0x702   : > { %2854 = vmatpush3.bf16.msra.mxu0 %v3239_v25 }
 0x704   : > { %3060 = vmatpush3.bf16.msra.mxu1 %v3239_v25 }
 0x7a7   : > { %v1901_v29 = vpop.f32.mrf.mxu1 }
 0x7a8   : > { %v4047_v30 = vadd.f32 %v1901_v29, %v1780_v27 }
 0x7a9   : > { %v1903_v31 = vpop.f32.mrf.mxu1 }
 0x7aa   : > { %v1920_v32 = vmul.f32 %v4047_v30, %v4047_v30  ;;  %v4051_v33 = vadd.f32 %v1903_v31, %v1784_v28 }
 0x7ab   : > { %v1905_v34 = vpop.f32.mrf.mxu1 }
 0x7ac   : > { %v1928_v35 = vmul.f32 %v1920_v32, %v4047_v30  ;;  %v1921_v36 = vmul.f32 %v4051_v33, %v4051_v33  ;;  %v4056_v37 = vadd.f32 %v1905_v34, %v1780_v27 }
 0x7ad   : > { %v1907_v21 = vpop.f32.mrf.mxu1 }
 0x7ae   : > { %v1936_v19 = vmul.f32 0.044715, %v1928_v35  ;;  %v1929_v20 = vmul.f32 %v1921_v36, %v4051_v33  ;;  %v1922_v38 = vmul.f32 %v4056_v37, %v4056_v37  ;;  %v4061_v39 = vadd.f32 %v1907_v21, %v1784_v28 }
 0x7af   : > { %v1911_v40 = vpop.f32.mrf.mxu1 }
 0x7b0   : > { %v1944_v41 = vadd.f32 %v1936_v19, %v4047_v30  ;;  %v1937_v42 = vmul.f32 0.044715, %v1929_v20  ;;  %v1930_v43 = vmul.f32 %v1922_v38, %v4056_v37  ;;  %v1923_v44 = vmul.f32 %v4061_v39, %v4061_v39 }
 0x7b1   : > { %v4067_v45 = vadd.f32 %v1911_v40, %v1780_v27  ;;  %v1913_v46 = vpop.f32.mrf.mxu1 }
 0x7b2   : > { %v1952_v22 = vmul.f32 0.7978846, %v1944_v41  ;;  %v1945_v47 = vadd.f32 %v1937_v42, %v4051_v33  ;;  %v1938_v48 = vmul.f32 0.044715, %v1930_v43  ;;  %v1931_v49 = vmul.f32 %v1923_v44, %v4061_v39 }
 0x7b3   : > { %v1924_v51 = vmul.f32 %v4067_v45, %v4067_v45  ;;  %v4073_v52 = vadd.f32 %v1913_v46, %v1784_v28  ;;  %v1915_v53 = vpop.f32.mrf.mxu1 }
 0x7b4   : > { %v1953_v55 = vmul.f32 0.7978846, %v1945_v47  ;;  %v1946_v59 = vadd.f32 %v1938_v48, %v4056_v37  ;;  %v1939_v50 = vmul.f32 0.044715, %v1931_v49  ;;  %3264 = vtanh.f32 %v1952_v22 }
 0x7b5   : > { %v1932_v57 = vmul.f32 %v1924_v51, %v4067_v45  ;;  %v1925_v60 = vmul.f32 %v4073_v52, %v4073_v52  ;;  %v1916_v62 = vadd.f32 %v1915_v53, %v1780_v27  ;;  %v1917_v54 = vpop.f32.mrf.mxu1 }
 0x7b6   : > { %3266 = vtanh.f32 %v1953_v55  ;;  %v1954_v63 = vmul.f32 0.7978846, %v1946_v59  ;;  %v1947_v0 = vadd.f32 %v1939_v50, %v4061_v39  ;;  %v1918_v1 = vadd.f32 %v1917_v54, %v1784_v28 }
 0x7b7   : > { %v1940_v56 = vmul.f32 0.044715, %v1932_v57  ;;  %v1933_v2 = vmul.f32 %v1925_v60, %v4073_v52  ;;  %v1926_v58 = vmul.f32 %v1916_v62, %v1916_v62 }
 0x7b8   : > { %3268 = vtanh.f32 %v1954_v63  ;;  %v1955_v5 = vmul.f32 0.7978846, %v1947_v0  ;;  %v1927_v6 = vmul.f32 %v1918_v1, %v1918_v1  ;;  %v2778_v0 = vld [vmem:[%s2775_s26 - $0x1] ss:$0 sm:$0xff] }
 0x7b9   : > { %v1948_v61 = vadd.f32 %v1940_v56, %v4067_v45  ;;  %v1941_v7 = vmul.f32 0.044715, %v1933_v2  ;;  %v1934_v8 = vmul.f32 %v1926_v58, %v1916_v62 }
 0x7ba   : > { %3270 = vtanh.f32 %v1955_v5  ;;  %v1935_v9 = vmul.f32 %v1927_v6, %v1918_v1 }
 0x7bb   : > { %v1956_v10 = vmul.f32 0.7978846, %v1948_v61  ;;  %v1949_v11 = vadd.f32 %v1941_v7, %v4073_v52  ;;  %v1942_v12 = vmul.f32 0.044715, %v1934_v8 }
 0x7bc   : > { %v1943_v13 = vmul.f32 0.044715, %v1935_v9 }
 0x7bd   : > { %3272 = vtanh.f32 %v1956_v10  ;;  %v1957_v14 = vmul.f32 0.7978846, %v1949_v11  ;;  %v1950_v17 = vadd.f32 %v1942_v12, %v1916_v62 }
 0x7be   : > { %v1951_v18 = vadd.f32 %v1943_v13, %v1918_v1 }
 0x7bf   : > { %3274 = vtanh.f32 %v1957_v14  ;;  %v1958_v23 = vmul.f32 0.7978846, %v1950_v17 }
 0x7c0   : > { %v1959_v24 = vmul.f32 0.7978846, %v1951_v18 }
 0x7c1   : > { %3276 = vtanh.f32 %v1958_v23  ;;  %v3265_v25 = vpop.eup %3264 }
 0x7c2   : > { %3278 = vtanh.f32 %v1959_v24  ;;  %v1968_v29 = vadd.f32 1.0, %v3265_v25 }
 0x7c3   : > { %v3267_v26 = vpop.eup %3266 }
 0x7c4   : > { %v1969_v27 = vadd.f32 1.0, %v3267_v26  ;;  %v1976_v21 = vmul.f32 0.5, %v1968_v29 }
 0x7c5   : > { %v3269_v28 = vpop.eup %3268 }
 0x7c6   : > { %v1970_v31 = vadd.f32 1.0, %v3269_v28  ;;  %v1977_v36 = vmul.f32 0.5, %v1969_v27  ;;  %v1984_v43 = vmul.f32 %v1976_v21, %v4047_v30 }
 0x7c7   : > { %v3271_v32 = vpop.eup %3270 }
 0x7c8   : > { %v1978_v34 = vmul.f32 0.5, %v1970_v31  ;;  %v1971_v35 = vadd.f32 1.0, %v3271_v32  ;;  %v1985_v41 = vmul.f32 %v1977_v36, %v4051_v33 }
 0x7ca   : > { %v3273_v19 = vpop.eup %3272  ;;  %v1979_v20 = vmul.f32 0.5, %v1971_v35  ;;  %v1986_v38 = vmul.f32 %v1978_v34, %v4056_v37 }
 0x7cb   : > { %v1972_v44 = vadd.f32 1.0, %v3273_v19 }
 0x7cc   : > { %v3275_v40 = vpop.eup %3274  ;;  %v1987_v42 = vmul.f32 %v1979_v20, %v4061_v39  ;;  %v2026_v51 = vpack.c.bf16 %v1986_v38, %v1984_v43 }
 0x7cd   : > { %v1973_v46 = vadd.f32 1.0, %v3275_v40  ;;  %v1980_v59 = vmul.f32 0.5, %v1972_v44 }
 0x7ce   : > { %v3277_v22 = vpop.eup %3276  ;;  %v2027_v47 = vpack.c.bf16 %v1987_v42, %v1985_v41 }
 0x7cf   : > { %v3279_v48 = vpop.eup %3278  ;;  %v1974_v49 = vadd.f32 1.0, %v3277_v22  ;;  %v1981_v55 = vmul.f32 0.5, %v1973_v46  ;;  %v1988_v30 = vmul.f32 %v1980_v59, %v4067_v45  ;;  %v2736_v59 = vld [vmem:[%s2187_s4] ss:$0 sm:$0xff] }
 0x7d0   : > { %2166 = vmatprep.mubr.bf16.mxu0 %v2027_v47  ;;  %v1975_v53 = vadd.f32 1.0, %v3279_v48 }
 0x7d1   : > { %v1982_v37 = vmul.f32 0.5, %v1974_v49  ;;  %2167 = vmatmul.mubr.bf16.vlgmr.msra.gmra.mxu0 %v2026_v51  ;;  %v1989_v39 = vmul.f32 %v1981_v55, %v4073_v52 }
 0x7d2   : > { %v1983_v50 = vmul.f32 0.5, %v1975_v53 }
 0x7d3   : > { %v1990_v33 = vmul.f32 %v1982_v37, %v1916_v62 }
 0x7d4   : > { %v1991_v57 = vmul.f32 %v1983_v50, %v1918_v1  ;;  %v2737_v50 = vld [vmem:[%s2189_s22] ss:$0 sm:$0xff] }
 0x7d5   : > { %v2028_v54 = vpack.c.bf16 %v1990_v33, %v1988_v30 }
 0x7d6   : > { %v2029_v60 = vpack.c.bf16 %v1991_v57, %v1989_v39 }
 0x7d8   : > { %2174 = vmatprep.mubr.bf16.mxu1 %v2029_v60 }
 0x7d9   : > { %2175 = vmatmul.mubr.bf16.vlgmr.msra.gmra.mxu1 %v2028_v54 }
 0x891   : > { %v2855_v63 = vpop.f32.mrf.mxu0 }
 0x893   : > { %v2856_v56 = vpop.f32.mrf.mxu0 }
 0x894   : > { %v2857_v2 = vadd.f32 %v2856_v56, %v2855_v63 }
 0x895   : > { %v2858_v58 = vpop.f32.mrf.mxu0 }
 0x896   : > { %v2169_v5 = vadd.f32 %v2857_v2, %v2778_v0 }
 0x897   : > { %v2859_v6 = vpop.f32.mrf.mxu0 }
 0x898   : > { %v2860_v61 = vadd.f32 %v2859_v6, %v2858_v58  ;;  %v4091_v62 = vadd.f32 %v2169_v5, %v4012_v15 }
 0x899   : > { %v2861_v52 = vpop.f32.mrf.mxu1 }
 0x89a   : > { %v2172_v1 = vadd.f32 %v2860_v61, %v2778_v0  ;;  %2191 = vadd.xlane.f32.xlu0 %v4091_v62  ;;  %v2203_v9 = vmul.f32 %v4091_v62, %v4091_v62 }
 0x89b   : > { %v2862_v45 = vpop.f32.mrf.mxu1 }
 0x89c   : > { %v2863_v7 = vadd.f32 %v2862_v45, %v2861_v52  ;;  %v4095_v8 = vadd.f32 %v2172_v1, %v4014_v16 }
 0x89d   : > { %v2864_v10 = vpop.f32.mrf.mxu1 }
 0x89e   : > { %v2177_v11 = vadd.f32 %v2863_v7, %v2778_v0  ;;  %2193 = vadd.xlane.f32.xlu1 %v4095_v8  ;;  %2207 = vadd.xlane.f32.xlu0 %v2203_v9  ;;  %v2204_v13 = vmul.f32 %v4095_v8, %v4095_v8 }
 0x89f   : > { %v2865_v12 = vpop.f32.mrf.mxu1 }
 0x8a0   : > { %v2866_v15 = vadd.f32 %v2865_v12, %v2864_v10  ;;  %v2185_v14 = vadd.f32 %v2177_v11, %v4020_v3 }
 0x8a2   : > { %v2180_v17 = vadd.f32 %v2866_v15, %v2778_v0  ;;  %2209 = vadd.xlane.f32.xlu1 %v2204_v13  ;;  %2195 = vadd.xlane.f32.xlu0 %v2185_v14  ;;  %v2205_v18 = vmul.f32 %v2185_v14, %v2185_v14 }
 0x8a4   : > { %v2186_v16 = vadd.f32 %v2180_v17, %v4022_v4 }
 0x8a6   : > { %2197 = vadd.xlane.f32.xlu1 %v2186_v16  ;;  %2211 = vadd.xlane.f32.xlu0 %v2205_v18  ;;  %v2206_v23 = vmul.f32 %v2186_v16, %v2186_v16 }
 0x8aa   : > { %2213 = vadd.xlane.f32.xlu1 %v2206_v23 }
 0x923   : > { %v2192_v24 = vpop.xlane.xlu0 %2191 }
 0x924   : > { %v2199_v25 = vmul.f32 0.0078125, %v2192_v24 }
 0x926   : > { %v2219_v28 = vmul.f32 %v2199_v25, %v2199_v25  ;;  %v2227_v53 = vsub.f32 %v4091_v62, %v2199_v25 }
 0x927   : > { %v2194_v26 = vpop.xlane.xlu1 %2193  ;;  %v2208_v27 = vpop.xlane.xlu0 %2207 }
 0x928   : > { %v2200_v29 = vmul.f32 0.0078125, %v2194_v26  ;;  %v2215_v31 = vmul.f32 0.0078125, %v2208_v27 }
 0x92a   : > { %v2223_v32 = vsub.f32 %v2215_v31, %v2219_v28  ;;  %v2220_v35 = vmul.f32 %v2200_v29, %v2200_v29  ;;  %v2228_v33 = vsub.f32 %v4095_v8, %v2200_v29 }
 0x92b   : > { %v2210_v34 = vpop.xlane.xlu1 %2209  ;;  %v2196_v3 = vpop.xlane.xlu0 %2195 }
 0x92c   : > { %v2231_v36 = vadd.f32 1e-05, %v2223_v32  ;;  %v2216_v21 = vmul.f32 0.0078125, %v2210_v34  ;;  %v2201_v19 = vmul.f32 0.0078125, %v2196_v3 }
 0x92e   : > { %3280 = vrsqrt.f32 %v2231_v36  ;;  %v2224_v4 = vsub.f32 %v2216_v21, %v2220_v35  ;;  %v2221_v41 = vmul.f32 %v2201_v19, %v2201_v19  ;;  %v2229_v63 = vsub.f32 %v2185_v14, %v2201_v19 }
 0x92f   : > { %v2198_v20 = vpop.xlane.xlu1 %2197  ;;  %v2212_v38 = vpop.xlane.xlu0 %2211 }
 0x930   : > { %v2232_v40 = vadd.f32 1e-05, %v2224_v4  ;;  %v2202_v42 = vmul.f32 0.0078125, %v2198_v20  ;;  %v2217_v43 = vmul.f32 0.0078125, %v2212_v38 }
 0x932   : > { %3282 = vrsqrt.f32 %v2232_v40  ;;  %v2225_v44 = vsub.f32 %v2217_v43, %v2221_v41  ;;  %v2222_v22 = vmul.f32 %v2202_v42, %v2202_v42  ;;  %v2230_v58 = vsub.f32 %v2186_v16, %v2202_v42 }
 0x933   : > { %v2214_v46 = vpop.xlane.xlu1 %2213 }
 0x934   : > { %v2233_v47 = vadd.f32 1e-05, %v2225_v44  ;;  %v2218_v48 = vmul.f32 0.0078125, %v2214_v46 }
 0x936   : > { %3284 = vrsqrt.f32 %v2233_v47  ;;  %v2226_v49 = vsub.f32 %v2218_v48, %v2222_v22 }
 0x938   : > { %v2234_v51 = vadd.f32 1e-05, %v2226_v49 }
 0x93a   : > { %3286 = vrsqrt.f32 %v2234_v51 }
 0x93b   : > { %v3281_v55 = vpop.eup %3280 }
 0x93c   : > { %v2239_v37 = vmul.f32 %v3281_v55, %v2227_v53 }
 0x93e   : > { %v2249_v39 = vmul.f32 %v2736_v59, %v2239_v37 }
 0x93f   : > { %v3283_v57 = vpop.eup %3282 }
 0x940   : > { %v2259_v30 = vadd.f32 %v2737_v50, %v2249_v39  ;;  %v2240_v60 = vmul.f32 %v3283_v57, %v2228_v33 }
 0x942   : > { %2263 = vst [vmem:[#allocation2 + $0x10] sm:$0xff] %v2259_v30  ;;  %v2250_v54 = vmul.f32 %v2736_v59, %v2240_v60 }
 0x943   : > { %v3285_v0 = vpop.eup %3284 }
 0x944   : > { %v2260_v56 = vadd.f32 %v2737_v50, %v2250_v54  ;;  %v2241_v2 = vmul.f32 %v3285_v0, %v2229_v63 }
 0x946   : > { %2264 = vst [vmem:[#allocation2] sm:$0xff] %v2260_v56  ;;  %v2251_v5 = vmul.f32 %v2736_v59, %v2241_v2 }
 0x947   : > { %v3287_v6 = vpop.eup %3286 }
 0x948   : > { %v2261_v61 = vadd.f32 %v2737_v50, %v2251_v5  ;;  %v2242_v62 = vmul.f32 %v3287_v6, %v2230_v58 }
 0x94a   : > { %2265 = vst [vmem:[#allocation2 + $0x18] sm:$0xff] %v2261_v61  ;;  %v2252_v52 = vmul.f32 %v2736_v59, %v2242_v62  ;;  %2270 = sbr.rel (%p2738_p5) target bundleno = 2836 (0xb14), region = 136 }
 0x94c   : > { %v2262_v1 = vadd.f32 %v2737_v50, %v2252_v52 }
 0x94e   : > { %2266 = vst [vmem:[#allocation2 + $0x8] sm:$0xff] %v2262_v1 }
 0x94f   : > { %v3288_v45 = vld [vmem:[%s4198_s17 + $0x38] sm:$0xff]   ;;  %v2287_v7 = vpack.c.bf16 %v2260_v56, %v2259_v30  ;;  %v3289_v8 = vld [vmem:[%s4198_s17 + $0x30] sm:$0xff]   ;;  %v3290_v9 = vld [vmem:[%s4198_s17 + $0x28] sm:$0xff]   ;;  %v2288_v16 = vpack.c.bf16 %v2262_v1, %v2261_v61 }
 0x950   : > { %3005 = vmatprep.subr.bf16.mxu0 %v3288_v45  ;;  %v3291_v10 = vld [vmem:[%s4198_s17 + $0x20] sm:$0xff]   ;;  %v3296_v11 = vld [vmem:[%s4200_s19 + $0x38] sm:$0xff]   ;;  %v3297_v12 = vld [vmem:[%s4200_s19 + $0x30] sm:$0xff]  }
 0x951   : > { %3021 = vmatprep.mubr.bf16.mxu0 %v2287_v7  ;;  %3006 = vmatpush3.bf16.msra.mxu0 %v3288_v45  ;;  %v3292_v15 = vld [vmem:[%s4198_s17 + $0x18] sm:$0xff]   ;;  %v3293_v13 = vld [vmem:[%s4198_s17 + $0x10] sm:$0xff]   ;;  %v3294_v14 = vld [vmem:[%s4198_s17 + $0x8] sm:$0xff]  }
 0x952   : > { %3007 = vmatprep.subr.bf16.mxu0 %v3289_v8  ;;  %3025 = vmatprep.subr.bf16.mxu1 %v3296_v11  ;;  %v3295_v17 = vld [vmem:[%s4198_s17] sm:$0xff]   ;;  %v3298_v18 = vld [vmem:[%s4200_s19 + $0x28] sm:$0xff]   ;;  %v3300_v24 = vld [vmem:[%s4200_s19 + $0x18] sm:$0xff]  }
 0x953   : > { %3026 = vmatpush3.bf16.msra.mxu1 %v3296_v11  ;;  %v3299_v23 = vld [vmem:[%s4200_s19 + $0x20] sm:$0xff]   ;;  %v3301_v25 = vld [vmem:[%s4200_s19 + $0x10] sm:$0xff]   ;;  %v3302_v26 = vld [vmem:[%s4200_s19 + $0x8] sm:$0xff]  }
 0x954   : > { %3027 = vmatprep.subr.bf16.mxu1 %v3297_v12  ;;  %v3303_v27 = vld [vmem:[%s4200_s19] sm:$0xff]   ;;  %v2739_v29 = vld [vmem:[#allocation13] ss:$0 sm:$0xff] }
 0x955   : > { %3008 = vmatpush3.bf16.msra.mxu0 %v3289_v8  ;;  %v2748_v42 = vld [vmem:[%s4234_s28] ss:$0 sm:$0xff] }
 0x956   : > { %3009 = vmatprep.subr.bf16.mxu0 %v3290_v9 }
 0x957   : > { %3028 = vmatpush3.bf16.msra.mxu1 %v3297_v12 }
 0x958   : > { %3029 = vmatprep.subr.bf16.mxu1 %v3298_v18 }
 0x959   : > { %3010 = vmatpush3.bf16.msra.mxu0 %v3290_v9 }
 0x95a   : > { %3011 = vmatprep.subr.bf16.mxu0 %v3291_v10 }
 0x95b   : > { %3030 = vmatpush3.bf16.msra.mxu1 %v3298_v18 }
 0x95c   : > { %3031 = vmatprep.subr.bf16.mxu1 %v3299_v23 }
 0x95d   : > { %3012 = vmatpush3.bf16.msra.mxu0 %v3291_v10 }
 0x95e   : > { %3013 = vmatprep.subr.bf16.mxu0 %v3292_v15 }
 0x95f   : > { %3032 = vmatpush3.bf16.msra.mxu1 %v3299_v23 }
 0x960   : > { %3033 = vmatprep.subr.bf16.mxu1 %v3300_v24 }
 0x961   : > { %3014 = vmatpush3.bf16.msra.mxu0 %v3292_v15 }
 0x962   : > { %3015 = vmatprep.subr.bf16.mxu0 %v3293_v13 }
 0x963   : > { %3034 = vmatpush3.bf16.msra.mxu1 %v3300_v24 }
 0x964   : > { %3035 = vmatprep.subr.bf16.mxu1 %v3301_v25 }
 0x965   : > { %3016 = vmatpush3.bf16.msra.mxu0 %v3293_v13 }
 0x966   : > { %3017 = vmatprep.subr.bf16.mxu0 %v3294_v14 }
 0x967   : > { %3036 = vmatpush3.bf16.msra.mxu1 %v3301_v25 }
 0x968   : > { %3037 = vmatprep.subr.bf16.mxu1 %v3302_v26 }
 0x969   : > { %3018 = vmatpush3.bf16.msra.mxu0 %v3294_v14 }
 0x96a   : > { %3019 = vmatprep.subr.bf16.mxu0 %v3295_v17 }
 0x96b   : > { %3038 = vmatpush3.bf16.msra.mxu1 %v3302_v26 }
 0x96c   : > { %3039 = vmatprep.subr.bf16.mxu1 %v3303_v27 }
 0x96d   : > { %3020 = vmatpush3.bf16.msra.mxu0 %v3295_v17 }
 0x96f   : > { %3040 = vmatpush3.bf16.msra.mxu1 %v3303_v27 }
 0x970   : > { %3022 = vmatmul.mubr.bf16.vlgmr.msra.gmra.mxu0 %v2288_v16 }
 0xa30   : > { %v3023_v28 = vpop.f32.mrf.mxu0 }
 0xa31   : > { %v2387_v35 = vadd.f32 %v3023_v28, %v2739_v29 }
 0xa32   : > { %v2378_v31 = vpop.f32.mrf.mxu0 }
 0xa33   : > { %v2379_v32 = vadd.f32 %v2739_v29, %v2378_v31 }
 0xa34   : > { %v3024_v34 = vpop.f32.mrf.mxu0 }
 0xa35   : > { %v2390_v3 = vadd.f32 %v3024_v34, %v2739_v29  ;;  %3304 = vtanh.f32 %v2379_v32 }
 0xa36   : > { %v2381_v36 = vpop.f32.mrf.mxu0 }
 0xa37   : > { %v2382_v21 = vadd.f32 %v2739_v29, %v2381_v36  ;;  %3306 = vtanh.f32 %v2390_v3 }
 0xa39   : > { %3308 = vtanh.f32 %v2382_v21 }
 0xa3a   : > { %3310 = vtanh.f32 %v2387_v35 }
 0xa42   : > { %v3305_v19 = vpop.eup %3304 }
 0xa44   : > { %v3307_v4 = vpop.eup %3306 }
 0xa46   : > { %v3309_v20 = vpop.eup %3308 }
 0xa47   : > { %v3311_v38 = vpop.eup %3310  ;;  %v2413_v40 = vpack.c.bf16 %v3309_v20, %v3305_v19 }
 0xa48   : > { %v2414_v41 = vpack.c.bf16 %v3307_v4, %v3311_v38 }
 0xa49   : > { %3041 = vmatprep.mubr.bf16.mxu1 %v2413_v40 }
 0xa4a   : > { %3042 = vmatmul.mubr.bf16.vlgmr.msra.gmra.mxu1 %v2414_v41 }
 0xb0a   : > { %v3043_v43 = vpop.f32.mrf.mxu1 }
 0xb0b   : > { %v2513_v44 = vadd.f32 %v3043_v43, %v2748_v42 }
 0xb0c   : > { %v2504_v46 = vpop.f32.mrf.mxu1 }
 0xb0d   : > { %2521 = vst [vmem:[%s4235_s29 + $0x10] sm:$0xff] %v2513_v44  ;;  %v2505_v22 = vadd.f32 %v2748_v42, %v2504_v46 }
 0xb0e   : > { %v3044_v47 = vpop.f32.mrf.mxu1 }
 0xb0f   : > { %2519 = vst [vmem:[%s4235_s29] sm:$0xff] %v2505_v22  ;;  %v2516_v48 = vadd.f32 %v3044_v47, %v2748_v42 }
 0xb10   : > { %v2507_v49 = vpop.f32.mrf.mxu1 }
 0xb11   : > { %2522 = vst [vmem:[%s4235_s29 + $0x18] sm:$0xff] %v2516_v48  ;;  %v2508_v51 = vadd.f32 %v2748_v42, %v2507_v49 }
 0xb13   : > { %2520 = vst [vmem:[%s4235_s29 + $0x8] sm:$0xff] %v2508_v51 }
 0xb14 PF: > { %s35_s2 = sadd.s32 1, %s3490_s2  }
 0xb15   : > { %p32_p1 = scmp.ge.s32.totalorder %s35_s2, 4  }
 0xb17   :  { %34 = sbr.rel (!%p32_p1) target bundleno = 13 (0xd), region = 172 }
 0xb1c   :  { %2534 = vsyncpa [#allocation6], 1 }
 0xb1d   :  { %2536 = vsyncpa [#allocation6 + $0x1], 1 }
 0xb1e   :  { %2537 = vsyncpa [#allocation8], 1 }
 0xb1f   :  { %2538 = vsyncpa [#allocation11], 1 }
 0xb20   :  { %2539 = vsyncpa [#allocation14], 1 }

</bundles_post_ra>
